<compile_context>
chip_gen: v6e
topology: v6e:2x2x1
jax: 0.10.0
libtpu: 0.0.40
codegen_flags: <defaults>
</compile_context>

<pallas_src>
import math
import jax
import jax.numpy as jnp
from jax.experimental import pallas as pl
from jax.experimental.pallas import tpu as pltpu

LANE = 128


def _lopn_fused_kernel(idx_a_ref, idx_b_ref,          # scalar prefetch (SMEM)
                       a_ref, b_ref,                  # gathered frames
                       wba_ref, wbb_ref, bb_ref,      # synthetic base net
                       w7_ref, b7_ref,                # fc7
                       w8_ref, b8_ref,                # fc8 (row block / bias)
                       o_ref,                         # (B, class_pad) output
                       acc_ref):                      # (B, class_pad) f32 scratch
    del idx_a_ref, idx_b_ref  # only used inside the index_maps
    p = pl.program_id(0)

    @pl.when(p == 0)
    def _():
        acc_ref[...] = jnp.zeros_like(acc_ref)

    # frames for this pair: (B, C*H*W); cast to bf16 only for the MXU dots
    a = a_ref[0].astype(wba_ref.dtype)
    b = b_ref[0].astype(wbb_ref.dtype)

    # synthetic base_network: Linear on the (C,2,H,W)-interleaved clip, split
    # into per-frame halves, + ReLU.  Accumulation / bias / relu in f32.
    f = (jnp.dot(a, wba_ref[...], preferred_element_type=jnp.float32)
         + jnp.dot(b, wbb_ref[...], preferred_element_type=jnp.float32)
         + bb_ref[...])
    f = jnp.maximum(f, 0.0)

    # fc7 + ReLU
    h = jnp.dot(f.astype(w7_ref.dtype), w7_ref[...],
                preferred_element_type=jnp.float32) + b7_ref[...]
    h = jnp.maximum(h, 0.0)

    # fc8 partial product: h_p @ w8[p*512:(p+1)*512, :]  (block via index_map)
    # Summing over pairs == torch.cat(pf, dim=1) @ w8.
    acc_ref[...] += jnp.dot(h.astype(w8_ref.dtype), w8_ref[...],
                            preferred_element_type=jnp.float32)

    @pl.when(p == pl.num_programs(0) - 1)
    def _():
        o_ref[...] = (acc_ref[...] + b8_ref[...]).astype(o_ref.dtype)


def init_params(key, C, H, W, feature_size, tuple_len):
    """Synthetic parameters (shapes mirror LOPN.__init__), prepped for the kernel."""
    f2 = feature_size * 2
    d_frame = C * H * W
    clip_flat_dim = 2 * d_frame
    pair_num = tuple_len * (tuple_len - 1) // 2
    class_num = math.factorial(tuple_len) // 2
    class_pad = max(LANE, ((class_num + LANE - 1) // LANE) * LANE)

    ks = jax.random.split(key, 6)
    # synthetic base_network: Linear(clip_flat_dim -> 2*feature_size) + ReLU
    wb = jax.random.normal(ks[0], (clip_flat_dim, f2), jnp.float32) * 0.02
    bb = jax.random.normal(ks[1], (1, f2), jnp.float32) * 0.02
    # fc7: Linear(feature_size*2, 512)
    w7 = jax.random.normal(ks[2], (f2, 512), jnp.float32) * 0.02
    b7 = jax.random.normal(ks[3], (1, 512), jnp.float32) * 0.02
    # fc8: Linear(512*pair_num, class_num)
    w8 = jax.random.normal(ks[4], (512 * pair_num, class_num), jnp.float32) * 0.02
    b8 = jax.random.normal(ks[5], (1, class_num), jnp.float32) * 0.02

    # Split wb into per-frame halves matching torch.stack([a, b], dim=2)'s
    # flatten order (c, s, h, w): s=0 rows -> frame a, s=1 rows -> frame b.
    wb_r = wb.reshape(C, 2, H * W, f2)
    wb_a = wb_r[:, 0].reshape(d_frame, f2)
    wb_b = wb_r[:, 1].reshape(d_frame, f2)

    # Pad fc8 columns to a lane-dense width (unmasked stores in-kernel).
    w8_p = jnp.zeros((512 * pair_num, class_pad), jnp.float32).at[:, :class_num].set(w8)
    b8_p = jnp.zeros((1, class_pad), jnp.float32).at[:, :class_num].set(b8)

    params = {
        "wb_a": wb_a.astype(jnp.bfloat16),
        "wb_b": wb_b.astype(jnp.bfloat16),
        "bb": bb,                              # f32
        "w7": w7.astype(jnp.bfloat16),
        "b7": b7,                              # f32
        "w8": w8_p.astype(jnp.bfloat16),
        "b8": b8_p,                            # f32
    }

    # Pair gather indices in the original loop order (ii < j) == cat order.
    ia, ib = [], []
    for ii in range(tuple_len):
        for j in range(ii + 1, tuple_len):
            ia.append(ii)
            ib.append(j)
    pair_idx = (jnp.asarray(ia, jnp.int32), jnp.asarray(ib, jnp.int32))
    return params, pair_idx, class_num


def lopn_forward(tup, params, pair_idx, class_num):
    """tup: (B, tuple_len, C, H, W) float32 -> (B, class_num) float32 logits."""
    B, T, C, H, W = tup.shape
    d_frame = C * H * W
    idx_a, idx_b = pair_idx
    P = int(idx_a.shape[0])
    f2 = params["w7"].shape[0]
    class_pad = params["w8"].shape[1]

    # Per-frame flattened view (T, B, d_frame); frames are gathered per pair
    # inside the kernel (input traffic O(T), no duplicated pair tensor).
    frames = jnp.swapaxes(tup, 0, 1).reshape(T, B, d_frame)

    grid_spec = pltpu.PrefetchScalarGridSpec(
        num_scalar_prefetch=2,
        grid=(P,),
        in_specs=[
            pl.BlockSpec((1, B, d_frame), lambda p, ia, ib: (ia[p], 0, 0)),  # frame a
            pl.BlockSpec((1, B, d_frame), lambda p, ia, ib: (ib[p], 0, 0)),  # frame b
            pl.BlockSpec((d_frame, f2), lambda p, ia, ib: (0, 0)),           # wb_a
            pl.BlockSpec((d_frame, f2), lambda p, ia, ib: (0, 0)),           # wb_b
            pl.BlockSpec((1, f2), lambda p, ia, ib: (0, 0)),                 # bb
            pl.BlockSpec((f2, 512), lambda p, ia, ib: (0, 0)),               # w7
            pl.BlockSpec((1, 512), lambda p, ia, ib: (0, 0)),                # b7
            pl.BlockSpec((512, class_pad), lambda p, ia, ib: (p, 0)),        # w8 block p
            pl.BlockSpec((1, class_pad), lambda p, ia, ib: (0, 0)),          # b8
        ],
        out_specs=pl.BlockSpec((B, class_pad), lambda p, ia, ib: (0, 0)),
        scratch_shapes=[pltpu.VMEM((B, class_pad), jnp.float32)],
    )

    out_padded = pl.pallas_call(
        _lopn_fused_kernel,
        out_shape=jax.ShapeDtypeStruct((B, class_pad), jnp.float32),
        grid_spec=grid_spec,
        compiler_params=pltpu.CompilerParams(
            # pair axis is a reduction into the fc8 accumulator
            dimension_semantics=("arbitrary",),
            vmem_limit_bytes=64 * 1024 * 1024,
        ),
    )(idx_a, idx_b, frames, frames,
      params["wb_a"], params["wb_b"], params["bb"],
      params["w7"], params["b7"], params["w8"], params["b8"])

    # dropout(p=0.5) is identity at inference time (eval mode) -> no-op.
    return out_padded[:, :class_num]


if __name__ == "__main__":
    # Small shapes consistent with the module's forward:
    # batch=2, tuple_len=3, channels=4, spatial=16, feature_size=64
    B, T, C, H, W = 2, 3, 4, 16, 16
    feature_size = 64

    key = jax.random.PRNGKey(0)
    k_in, k_par = jax.random.split(key)
    tup = jax.random.normal(k_in, (B, T, C, H, W), jnp.float32)

    params, pair_idx, class_num = init_params(k_par, C, H, W, feature_size, T)

    out = lopn_forward(tup, params, pair_idx, class_num)
    out = jax.block_until_ready(out)
    assert out.shape == (B, class_num), out.shape
    print("KERNEL_OK")
</pallas_src>

<mosaic_0001>
module attributes {stable_mosaic.version = 11 : i64} {
  func.func @_lopn_fused_kernel(%arg0: i32, %arg1: memref<3xi32, #tpu.memory_space<smem>>, %arg2: memref<3xi32, #tpu.memory_space<smem>>, %arg3: memref<1x2x1024xf32, #tpu.memory_space<vmem>>, %arg4: memref<1x2x1024xf32, #tpu.memory_space<vmem>>, %arg5: memref<1024x128xbf16, #tpu.memory_space<vmem>>, %arg6: memref<1024x128xbf16, #tpu.memory_space<vmem>>, %arg7: memref<1x128xf32, #tpu.memory_space<vmem>>, %arg8: memref<128x512xbf16, #tpu.memory_space<vmem>>, %arg9: memref<1x512xf32, #tpu.memory_space<vmem>>, %arg10: memref<512x128xbf16, #tpu.memory_space<vmem>>, %arg11: memref<1x128xf32, #tpu.memory_space<vmem>>, %arg12: memref<2x128xf32, #tpu.memory_space<vmem>>, %arg13: memref<2x128xf32, #tpu.memory_space<vmem>>) attributes {dimension_semantics = [#tpu.dimension_semantics<arbitrary>], iteration_bounds = array<i64: 3>, scalar_prefetch = 2 : i64, scratch_operands = 1 : i64, tpu.core_type = #tpu.core_type<tc>, window_params = [{transform_indices = @transform_0, window_bounds = array<i64: 1, 2, 1024>}, {transform_indices = @transform_1, window_bounds = array<i64: 1, 2, 1024>}, {pipeline_mode = #tpu.pipeline_mode<synchronous>, transform_indices = @transform_2, window_bounds = array<i64: 1024, 128>}, {pipeline_mode = #tpu.pipeline_mode<synchronous>, transform_indices = @transform_3, window_bounds = array<i64: 1024, 128>}, {pipeline_mode = #tpu.pipeline_mode<synchronous>, transform_indices = @transform_4, window_bounds = array<i64: 1, 128>}, {pipeline_mode = #tpu.pipeline_mode<synchronous>, transform_indices = @transform_5, window_bounds = array<i64: 128, 512>}, {pipeline_mode = #tpu.pipeline_mode<synchronous>, transform_indices = @transform_6, window_bounds = array<i64: 1, 512>}, {transform_indices = @transform_7, window_bounds = array<i64: 512, 128>}, {pipeline_mode = #tpu.pipeline_mode<synchronous>, transform_indices = @transform_8, window_bounds = array<i64: 1, 128>}, {pipeline_mode = #tpu.pipeline_mode<synchronous>, transform_indices = @transform_9, window_bounds = array<i64: 2, 128>}]} {
    %c0_i32 = arith.constant 0 : i32
    %0 = arith.cmpi eq, %arg0, %c0_i32 : i32
    %1 = arith.extui %0 : i1 to i32
    %c0_i32_0 = arith.constant 0 : i32
    %2 = arith.cmpi ne, %1, %c0_i32_0 : i32
    scf.if %2 {
      %cst_28 = arith.constant 0.000000e+00 : f32
      %36 = vector.broadcast %cst_28 : f32 to vector<2x128xf32>
      %c0_29 = arith.constant 0 : index
      %c0_30 = arith.constant 0 : index
      %37 = vector.load %arg13[%c0_29, %c0_30] : memref<2x128xf32, #tpu.memory_space<vmem>>, vector<2x128xf32>
      tpu.vector_store %arg13[%c0_29, %c0_30], %36 {strides = array<i32>} : memref<2x128xf32, #tpu.memory_space<vmem>>, vector<2x128xf32>,
    } else {
    }
    %c0 = arith.constant 0 : index
    %c0_1 = arith.constant 0 : index
    %c0_2 = arith.constant 0 : index
    %3 = vector.load %arg3[%c0, %c0_1, %c0_2] : memref<1x2x1024xf32, #tpu.memory_space<vmem>>, vector<1x2x1024xf32>
    %4 = vector.shape_cast %3 : vector<1x2x1024xf32> to vector<2x1024xf32>
    %5 = arith.truncf %4 : vector<2x1024xf32> to vector<2x1024xbf16>
    %c0_3 = arith.constant 0 : index
    %c0_4 = arith.constant 0 : index
    %c0_5 = arith.constant 0 : index
    %6 = vector.load %arg4[%c0_3, %c0_4, %c0_5] : memref<1x2x1024xf32, #tpu.memory_space<vmem>>, vector<1x2x1024xf32>
    %7 = vector.shape_cast %6 : vector<1x2x1024xf32> to vector<2x1024xf32>
    %8 = arith.truncf %7 : vector<2x1024xf32> to vector<2x1024xbf16>
    %c0_6 = arith.constant 0 : index
    %c0_7 = arith.constant 0 : index
    %9 = vector.load %arg5[%c0_6, %c0_7] : memref<1024x128xbf16, #tpu.memory_space<vmem>>, vector<1024x128xbf16>
    %cst = arith.constant dense<0.000000e+00> : vector<2x128xf32>
    %10 = tpu.matmul %5, %9, %cst {dimension_numbers = #tpu.dot_dimension_numbers<[1], [0], [0], [1], [0, 0, 1, 1], [], []>} : vector<2x1024xbf16>, vector<1024x128xbf16>, vector<2x128xf32> -> vector<2x128xf32>
    %c0_8 = arith.constant 0 : index
    %c0_9 = arith.constant 0 : index
    %11 = vector.load %arg6[%c0_8, %c0_9] : memref<1024x128xbf16, #tpu.memory_space<vmem>>, vector<1024x128xbf16>
    %cst_10 = arith.constant dense<0.000000e+00> : vector<2x128xf32>
    %12 = tpu.matmul %8, %11, %cst_10 {dimension_numbers = #tpu.dot_dimension_numbers<[1], [0], [0], [1], [0, 0, 1, 1], [], []>} : vector<2x1024xbf16>, vector<1024x128xbf16>, vector<2x128xf32> -> vector<2x128xf32>
    %13 = arith.addf %10, %12 : vector<2x128xf32>
    %c0_11 = arith.constant 0 : index
    %c0_12 = arith.constant 0 : index
    %14 = vector.load %arg7[%c0_11, %c0_12] : memref<1x128xf32, #tpu.memory_space<vmem>>, vector<1x128xf32>
    %15 = vector.broadcast %14 : vector<1x128xf32> to vector<2x128xf32>
    %16 = arith.addf %13, %15 : vector<2x128xf32>
    %cst_13 = arith.constant 0.000000e+00 : f32
    %17 = vector.broadcast %cst_13 : f32 to vector<2x128xf32>
    %18 = arith.maximumf %16, %17 : vector<2x128xf32>
    %19 = arith.truncf %18 : vector<2x128xf32> to vector<2x128xbf16>
    %c0_14 = arith.constant 0 : index
    %c0_15 = arith.constant 0 : index
    %20 = vector.load %arg8[%c0_14, %c0_15] : memref<128x512xbf16, #tpu.memory_space<vmem>>, vector<128x512xbf16>
    %cst_16 = arith.constant dense<0.000000e+00> : vector<2x512xf32>
    %21 = tpu.matmul %19, %20, %cst_16 {dimension_numbers = #tpu.dot_dimension_numbers<[1], [0], [0], [1], [0, 0, 1, 1], [], []>} : vector<2x128xbf16>, vector<128x512xbf16>, vector<2x512xf32> -> vector<2x512xf32>
    %c0_17 = arith.constant 0 : index
    %c0_18 = arith.constant 0 : index
    %22 = vector.load %arg9[%c0_17, %c0_18] : memref<1x512xf32, #tpu.memory_space<vmem>>, vector<1x512xf32>
    %23 = vector.broadcast %22 : vector<1x512xf32> to vector<2x512xf32>
    %24 = arith.addf %21, %23 : vector<2x512xf32>
    %cst_19 = arith.constant 0.000000e+00 : f32
    %25 = vector.broadcast %cst_19 : f32 to vector<2x512xf32>
    %26 = arith.maximumf %24, %25 : vector<2x512xf32>
    %c0_20 = arith.constant 0 : index
    %c0_21 = arith.constant 0 : index
    %27 = vector.load %arg13[%c0_20, %c0_21] : memref<2x128xf32, #tpu.memory_space<vmem>>, vector<2x128xf32>
    %28 = arith.truncf %26 : vector<2x512xf32> to vector<2x512xbf16>
    %c0_22 = arith.constant 0 : index
    %c0_23 = arith.constant 0 : index
    %29 = vector.load %arg10[%c0_22, %c0_23] : memref<512x128xbf16, #tpu.memory_space<vmem>>, vector<512x128xbf16>
    %cst_24 = arith.constant dense<0.000000e+00> : vector<2x128xf32>
    %30 = tpu.matmul %28, %29, %cst_24 {dimension_numbers = #tpu.dot_dimension_numbers<[1], [0], [0], [1], [0, 0, 1, 1], [], []>} : vector<2x512xbf16>, vector<512x128xbf16>, vector<2x128xf32> -> vector<2x128xf32>
    %31 = arith.addf %27, %30 : vector<2x128xf32>
    %c0_25 = arith.constant 0 : index
    %c0_26 = arith.constant 0 : index
    %32 = vector.load %arg13[%c0_25, %c0_26] : memref<2x128xf32, #tpu.memory_space<vmem>>, vector<2x128xf32>
    tpu.vector_store %arg13[%c0_25, %c0_26], %31 {strides = array<i32>} : memref<2x128xf32, #tpu.memory_space<vmem>>, vector<2x128xf32>,
    %c2_i32 = arith.constant 2 : i32
    %33 = arith.cmpi eq, %arg0, %c2_i32 : i32
    %34 = arith.extui %33 : i1 to i32
    %c0_i32_27 = arith.constant 0 : i32
    %35 = arith.cmpi ne, %34, %c0_i32_27 : i32
    scf.if %35 {
      %c0_28 = arith.constant 0 : index
      %c0_29 = arith.constant 0 : index
      %36 = vector.load %arg13[%c0_28, %c0_29] : memref<2x128xf32, #tpu.memory_space<vmem>>, vector<2x128xf32>
      %c0_30 = arith.constant 0 : index
      %c0_31 = arith.constant 0 : index
      %37 = vector.load %arg11[%c0_30, %c0_31] : memref<1x128xf32, #tpu.memory_space<vmem>>, vector<1x128xf32>
      %38 = vector.broadcast %37 : vector<1x128xf32> to vector<2x128xf32>
      %39 = arith.addf %36, %38 : vector<2x128xf32>
      %c0_32 = arith.constant 0 : index
      %c0_33 = arith.constant 0 : index
      %40 = vector.load %arg12[%c0_32, %c0_33] : memref<2x128xf32, #tpu.memory_space<vmem>>, vector<2x128xf32>
      tpu.vector_store %arg12[%c0_32, %c0_33], %39 {strides = array<i32>} : memref<2x128xf32, #tpu.memory_space<vmem>>, vector<2x128xf32>,
    } else {
    }
    return
  }
  func.func @transform_0(%arg0: i32, %arg1: memref<3xi32, #tpu.memory_space<smem>>, %arg2: memref<3xi32, #tpu.memory_space<smem>>) -> (i32, i32, i32) {
    %0 = arith.index_cast %arg0 : i32 to index
    %1 = memref.load %arg1[%0] : memref<3xi32, #tpu.memory_space<smem>>
    %c0_i32 = arith.constant 0 : i32
    %c0_i32_0 = arith.constant 0 : i32
    %c0_i32_1 = arith.constant 0 : i32
    return %1, %c0_i32, %c0_i32_0 : i32, i32, i32
  }
  func.func @transform_1(%arg0: i32, %arg1: memref<3xi32, #tpu.memory_space<smem>>, %arg2: memref<3xi32, #tpu.memory_space<smem>>) -> (i32, i32, i32) {
    %0 = arith.index_cast %arg0 : i32 to index
    %1 = memref.load %arg2[%0] : memref<3xi32, #tpu.memory_space<smem>>
    %c0_i32 = arith.constant 0 : i32
    %c0_i32_0 = arith.constant 0 : i32
    %c0_i32_1 = arith.constant 0 : i32
    return %1, %c0_i32, %c0_i32_0 : i32, i32, i32
  }
  func.func @transform_2(%arg0: i32, %arg1: memref<3xi32, #tpu.memory_space<smem>>, %arg2: memref<3xi32, #tpu.memory_space<smem>>) -> (i32, i32) {
    %c0_i32 = arith.constant 0 : i32
    %c0_i32_0 = arith.constant 0 : i32
    %c0_i32_1 = arith.constant 0 : i32
    return %c0_i32, %c0_i32_0 : i32, i32
  }
  func.func @transform_3(%arg0: i32, %arg1: memref<3xi32, #tpu.memory_space<smem>>, %arg2: memref<3xi32, #tpu.memory_space<smem>>) -> (i32, i32) {
    %c0_i32 = arith.constant 0 : i32
    %c0_i32_0 = arith.constant 0 : i32
    %c0_i32_1 = arith.constant 0 : i32
    return %c0_i32, %c0_i32_0 : i32, i32
  }
  func.func @transform_4(%arg0: i32, %arg1: memref<3xi32, #tpu.memory_space<smem>>, %arg2: memref<3xi32, #tpu.memory_space<smem>>) -> (i32, i32) {
    %c0_i32 = arith.constant 0 : i32
    %c0_i32_0 = arith.constant 0 : i32
    %c0_i32_1 = arith.constant 0 : i32
    return %c0_i32, %c0_i32_0 : i32, i32
  }
  func.func @transform_5(%arg0: i32, %arg1: memref<3xi32, #tpu.memory_space<smem>>, %arg2: memref<3xi32, #tpu.memory_space<smem>>) -> (i32, i32) {
    %c0_i32 = arith.constant 0 : i32
    %c0_i32_0 = arith.constant 0 : i32
    %c0_i32_1 = arith.constant 0 : i32
    return %c0_i32, %c0_i32_0 : i32, i32
  }
  func.func @transform_6(%arg0: i32, %arg1: memref<3xi32, #tpu.memory_space<smem>>, %arg2: memref<3xi32, #tpu.memory_space<smem>>) -> (i32, i32) {
    %c0_i32 = arith.constant 0 : i32
    %c0_i32_0 = arith.constant 0 : i32
    %c0_i32_1 = arith.constant 0 : i32
    return %c0_i32, %c0_i32_0 : i32, i32
  }
  func.func @transform_7(%arg0: i32, %arg1: memref<3xi32, #tpu.memory_space<smem>>, %arg2: memref<3xi32, #tpu.memory_space<smem>>) -> (i32, i32) {
    %c0_i32 = arith.constant 0 : i32
    %c0_i32_0 = arith.constant 0 : i32
    return %arg0, %c0_i32 : i32, i32
  }
  func.func @transform_8(%arg0: i32, %arg1: memref<3xi32, #tpu.memory_space<smem>>, %arg2: memref<3xi32, #tpu.memory_space<smem>>) -> (i32, i32) {
    %c0_i32 = arith.constant 0 : i32
    %c0_i32_0 = arith.constant 0 : i32
    %c0_i32_1 = arith.constant 0 : i32
    return %c0_i32, %c0_i32_0 : i32, i32
  }
  func.func @transform_9(%arg0: i32, %arg1: memref<3xi32, #tpu.memory_space<smem>>, %arg2: memref<3xi32, #tpu.memory_space<smem>>) -> (i32, i32) {
    %c0_i32 = arith.constant 0 : i32
    %c0_i32_0 = arith.constant 0 : i32
    %c0_i32_1 = arith.constant 0 : i32
    return %c0_i32, %c0_i32_0 : i32, i32
  }
}

</mosaic_0001>

<bundles_post_ra>
// kernel: tpu_custom_call.1
= control target key start
LH: loop header
LB: loop body
LE: loop exit
PB: predicated region body
PF: predicated region fallthrough
CT: control target
= control target key end

     0   :  { %s3854_s17 = smov [#allocation4]   ;;  %s4402_s0 = inlined_call_operand.hbm [shape: s32[3], index: 0, kind: input, shape index: {}]   ;;  %s4403_s2 = inlined_call_operand.hbm [shape: f32[3,2,1024], index: 2, kind: input, shape index: {}]   ;;  %s4404_s3 = inlined_call_operand.hbm [shape: f32[3,2,1024], index: 3, kind: input, shape index: {}]   ;;  %s4405_s4 = inlined_call_operand.hbm [shape: bf16[1024,128], index: 4, kind: input, shape index: {}]   ;;  %s4406_s5 = inlined_call_operand.hbm [shape: bf16[1024,128], index: 5, kind: input, shape index: {}]   ;;  %s4407_s6 = inlined_call_operand.vmem [shape: f32[1,128], index: 6, kind: input, shape index: {}]   ;;  %s4408_s7 = inlined_call_operand.hbm [shape: bf16[128,512], index: 7, kind: input, shape index: {}]   ;;  %s4409_s8 = inlined_call_operand.vmem [shape: f32[1,512], index: 8, kind: input, shape index: {}]   ;;  %s4410_s9 = inlined_call_operand.hbm [shape: bf16[1536,128], index: 9, kind: input, shape index: {}]   ;;  %s4411_s10 = inlined_call_operand.vmem [shape: f32[1,128], index: 10, kind: input, shape index: {}]   ;;  %s4412_s11 = inlined_call_operand.hbm [shape: f32[2,128], index: 11, kind: output, shape index: {}]   ;;  %s4413_s1 = inlined_call_operand.vmem [shape: s32[3], index: 1, kind: input, shape index: {}]  }
   0x1   :  { %4426 = sst [smem:[#allocation32_spill]] %s4405_s4  ;;  %s18_s22 = sshll.u32 %s4413_s1, 4  ;;  %s19_s22 = int_to_ptr.vmem [resolvable:$true] %s18_s22 }
   0x2   :  { %4427 = sst [smem:[#allocation33_spill]] %s4406_s5  ;;  %s3550_s23 = scalar_lea.vmem %s19_s22, 16 }
   0x3   :  { %4428 = sst [smem:[#allocation34_spill]] %s4407_s6  ;;  %p3551_p0 = scmp.ne.s32.totalorder %s19_s22, %s3550_s23 }
   0x4   :  { %4429 = sst [smem:[#allocation35_spill]] %s4408_s7  ;;  %p3555_p1 = scmp.lt.s32.totalorder %s19_s22, %s19_s22 }
   0x5   :  { %4430 = sst [smem:[#allocation36_spill]] %s4409_s8  ;;  %p3556_p2 = scmp.lt.s32.totalorder %s3550_s23, %s3550_s23 }
   0x6   :  { %4431 = sst [smem:[#allocation37_spill]] %s4411_s10 }
   0x7   :  { %4432 = sst [smem:[#allocation38_spill]] %s4412_s11  ;;  %p3557_p3 = por %p3556_p2, %p3555_p1 }
   0x8   :  { %17 = dma.hbm_to_smem %s4402_s0, 16, %s3854_s17, [#allocation3] }
   0x9   :  { %p3558_p4 = pnand %p3557_p3, %p3551_p0 }
   0xb   :  { %3561 = shalt.err (!%p3558_p4)  }
   0xc   :  { %s3855_s24 = smov [#allocation5]  }
   0xd   :  { %21 = dma.vmem_to_smem %s19_s22, 16, %s3855_s24, [#allocation3] }
   0xe   :  { %3788 = dma.done.wait [#allocation3], 32 }
   0xf   :  { %3789 = vsyncadd [#allocation3], 4294967264 }
  0x10   :  { %23 = sfence }
  0x11   :  { %24 = vsyncpa [#allocation7], 0 }
  0x12   :  { %26 = vsyncpa [#allocation7 + $0x1], 0 }
  0x13   :  { %27 = vsyncpa [#allocation10], 0 }
  0x14   :  { %29 = vsyncpa [#allocation10 + $0x1], 0 }
  0x15   :  { %30 = vsyncpa [#allocation13], 0 }
  0x16   :  { %31 = vsyncpa [#allocation16], 0 }
  0x17   :  { %33 = vsyncpa [#allocation16 + $0x1], 0 }
  0x18   :  { %34 = vsyncpa [#allocation8], 0  ;;  %s3936_s0 = smov 0   ;;  %s3938_s1 = smov 0  }
  0x19   :  { %s3940_s25 = smov 0   ;;  %s3942_s26 = smov 0  }
  0x1a   :  { %s3944_s27 = smov 0   ;;  %s3946_s28 = smov 0  }
  0x1b   :  { %s3948_s29 = smov 0   ;;  %s3950_s30 = smov 0  }
  0x1c   :  { %s3952_s12 = smov 0   ;;  %s3954_s13 = smov 0  }
  0x1d LB: > { %4433 = sst [smem:[#allocation29_spill]] %s3832_s27  ;;  %s3856_s14 = smov [#allocation11]   ;;  %s3852_s13 = sphi %s3954_s13, %s4490_s13   ;;  %s3848_s12 = sphi %s3952_s12, %s4481_s12   ;;  %s3844_s30 = sphi %s3950_s30, %s4489_s30   ;;  %s3840_s29 = sphi %s3948_s29, %s4488_s29   ;;  %s3836_s28 = sphi %s3946_s28, %s4487_s28   ;;  %s3832_s27 = sphi %s3944_s27, %s4486_s27   ;;  %s3828_s26 = sphi %s3942_s26, %s4485_s26   ;;  %s3824_s25 = sphi %s3940_s25, %s4484_s25   ;;  %s3820_s1 = sphi %s3938_s1, %s4483_s1   ;;  %s3816_s0 = sphi %s3936_s0, %s4482_s0  }
  0x1e   : > { %4434 = sst [smem:[#allocation30_spill]] %s3848_s12  ;;  %s286_s15 = sshll.u32 %s3856_s14, 4  ;;  %s287_s15 = int_to_ptr.vmem [resolvable:$true] %s286_s15 }
  0x1f   : > { %s3987_s16 = sadd.s32 4294967295, %s3852_s13   ;;  %p2734_p5 = scmp.ge.s32.totalorder %s3852_s13, 1 }
  0x20   : > { %p4419_p6 = scmp.eq.s32.totalorder %s3987_s16, 0  ;;  %p274_p7 = scmp.lt.s32.totalorder %s3852_s13, 4 }
  0x21   : > { %s3857_s18 = smov [#allocation12]   ;;  %s3858_s21 = smov [#allocation14]  }
  0x22   : > { %p3993_p9 = pnand %p2734_p5, %p274_p7  ;;  %s299_s19 = sshll.u32 %s3857_s18, 4  ;;  %s4005_s19 = int_to_ptr.vmem [resolvable:$true] %s299_s19 }
  0x23   : > { %s315_s22 = sshll.u32 %s3858_s21, 4  ;;  %s3573_s23 = scalar_lea.vmem %s287_s15, 8192  ;;  %s4007_s22 = int_to_ptr.vmem [resolvable:$true] %s315_s22 }
  0x24   : > { %s4435_s17 = scalar_select %p3993_p9, 1, 0 }
  0x25   : > { %p3204_p10 = pneg %p3993_p9  ;;  %p3574_p13 = scmp.ne.s32.totalorder %s287_s15, %s3573_s23 }
  0x26   : > { %p3581_p2 = scmp.lt.s32.totalorder %s287_s15, %s287_s15  ;;  %p3582_p3 = scmp.lt.s32.totalorder %s3573_s23, %s3573_s23 }
  0x27   : > { %p4001_p11 = pnand %p3204_p10, %p4419_p6 }
  0x28   : > { %p3583_p4 = por %p3582_p3, %p3581_p2 }
  0x29   : > { %p3564_p12 = pneg %p4001_p11 }
  0x2b   : > { %p3576_p0 = pnand %p3574_p13, %p3564_p12 }
  0x2d   : > { %p3577_p1 = pneg %p3576_p0 }
  0x2f   : > { %p3584_p5 = pnand %p3583_p4, %p3577_p1 }
  0x31   : > { %3587 = shalt.err (!%p3584_p5)
}
  0x32   : > { %s4414_s24 = smov 64   ;;  %s4415_s14 = smov 4  }
  0x33   : > { %s4437_s4 = sld [smem:[#allocation32_spill]]  ;;  %s3599_s11 = scalar_lea.vmem %s4005_s19, 8192 }
  0x34   : > { %p3600_p7 = scmp.ne.s32.totalorder %s4005_s19, %s3599_s11  ;;  %p3607_p0 = scmp.lt.s32.totalorder %s4005_s19, %s4005_s19 }
  0x35   : > { %p3608_p1 = scmp.lt.s32.totalorder %s3599_s11, %s3599_s11 }
  0x36   : > { %p3602_p10 = pnand %p3600_p7, %p3564_p12 }
  0x37   : > { %p3609_p2 = por %p3608_p1, %p3607_p0 }
  0x38   : > { %p3603_p13 = pneg %p3602_p10 }
  0x39   : > { %3207 = dma.hbm_to_vmem [thread:$0]  (!%p4001_p11), %s4437_s4, 8192, %s287_s15, [#allocation10], %s4414_s24, %s4414_s24, %s4415_s14  }
  0x3a   : > { %p3610_p3 = pnand %p3609_p2, %p3603_p13 }
  0x3c   : > { %3613 = shalt.err (!%p3610_p3)
}
  0x3d   : > { %s4438_s5 = sld [smem:[#allocation33_spill]]  ;;  %s3625_s18 = scalar_lea.vmem %s4007_s22, 4096 }
  0x3e   : > { %p3626_p4 = scmp.ne.s32.totalorder %s4007_s22, %s3625_s18  ;;  %p3633_p10 = scmp.lt.s32.totalorder %s4007_s22, %s4007_s22 }
  0x3f   : > { %p3634_p13 = scmp.lt.s32.totalorder %s3625_s18, %s3625_s18 }
  0x40   : > { %p3628_p5 = pnand %p3626_p4, %p3564_p12 }
  0x41   : > { %p3635_p0 = por %p3634_p13, %p3633_p10 }
  0x42   : > { %p3629_p7 = pneg %p3628_p5 }
  0x43   : > { %3210 = dma.hbm_to_vmem [thread:$0]  (!%p4001_p11), %s4438_s5, 8192, %s4005_s19, [#allocation13], %s4414_s24, %s4414_s24, %s4415_s14  }
  0x44   : > { %p3636_p1 = pnand %p3635_p0, %p3629_p7 }
  0x46   : > { %3639 = shalt.err (!%p3636_p1)
}
  0x47   : > { %s3861_s11 = smov 256   ;;  %s3862_s19 = smov 16  }
  0x48   : > { %s4439_s7 = sld [smem:[#allocation35_spill]]  ;;  %s4052_s15 = sadd.s32 1, %s3852_s13  }
  0x49   : > { %s44_s18 = sld [smem:[#allocation4 + %s3852_s13]]  ;;  %s49_s24 = sadd.s32 1, %s3848_s12 }
  0x4a   : > { %s45_s14 = sld [smem:[#allocation4 + %s4052_s15]]  ;;  %p56_p12 = scmp.ne.s32.totalorder %s3848_s12, %s3844_s30 }
  0x4b   : > { %p4418_p2 = scmp.eq.s32.totalorder %s3852_s13, 0  ;;  %p62_p3 = scmp.ne.s32.totalorder %s3844_s30, %s3840_s29 }
  0x4c   : > { %p4420_p4 = scmp.lt.s32.totalorder %s3852_s13, 3  ;;  %s335_s4 = sand.u32 1, %s3848_s12  }
  0x4d   : > { %p4066_p5 = por %p4418_p2, %p56_p12  ;;  %s2739_s29 = sshll.u32 %s335_s4, 4 }
  0x4e   : > { %3213 = dma.hbm_to_vmem [thread:$0]  (!%p4001_p11), %s4439_s7, 4096, %s4007_s22, [#allocation13], %s3861_s11, %s3861_s11, %s3862_s19  }
  0x4f   : > { %p4072_p11 = por %p4419_p6, %p62_p3  ;;  %p4080_p7 = pnand %p4420_p4, %p4066_p5 }
  0x50   : > { %s46_s19 = ssub.s32 %s44_s18, %s45_s14  ;;  %s339_s21 = scalar_lea.vmem [#allocation6], %s2739_s29 }
  0x51   : > { %s4441_s22 = scalar_select %p4072_p11, 1, 0 }
  0x52   : > { %s348_s23 = sshll.u32 %s339_s21, 4  ;;  %p47_p10 = scmp.eq.s32.totalorder %s46_s19, 0  ;;  %s4084_s23 = int_to_ptr.vmem [resolvable:$true] %s348_s23 }
  0x53   : > { %s3184_s5 = scalar_select %p4066_p5, [#allocation4], [#allocation18] }
  0x54   : > { %s4089_s7 = scalar_select %p47_p10, %s3848_s12, %s49_s24  }
  0x55   : > { %s3185_s10 = scalar_select %p4066_p5, %s3852_s13, 0 }
  0x56   : > { %4443 = sst [smem:[#allocation31_spill]] %s4089_s7  ;;  %s4492_s5 = smov (!%p4420_p4, %s3184_s5), [#allocation20] }
  0x57   : > { %s4494_s10 = smov (!%p4420_p4, %s3185_s10), 0  ;;  %s4099_s18 = sld [smem:[#allocation5 + %s3852_s13]] }
  0x58   : > { %s340_s14 = sld [smem:[%s4492_s5 + %s4494_s10]]  ;;  %p84_p13 = scmp.ne.s32.totalorder %s3836_s28, %s3832_s27 }
  0x59   : > { %s4103_s21 = sld [smem:[#allocation5 + %s4052_s15]]  ;;  %p90_p0 = scmp.ne.s32.totalorder %s3832_s27, %s3828_s26 }
  0x5a   : > { %p4112_p1 = por %p84_p13, %p4418_p2  ;;  %s336_s10 = scalar_lea.sflag [#allocation7], %s335_s4 }
  0x5b   : > { %p4121_p12 = por %p90_p0, %p4419_p6  ;;  %p3642_p5 = pneg %p4080_p7 }
  0x5c   : > { %s4444_s24 = scalar_select %p4112_p1, 1, 0 }
  0x5d   : > { %s4445_s5 = scalar_select %p4121_p12, 1, 0 }
  0x5e   : > { %s2955_s8 = sshll.u32 %s340_s14, 8  ;;  %s3645_s19 = scalar_lea.hbm %s4403_s2, 768 }
  0x5f   : > { %s346_s12 = scalar_lea.hbm %s4403_s2, %s2955_s8 }
  0x60   : > { %s3640_s29 = scalar_lea.hbm %s346_s12, 256  ;;  %p3646_p13 = scmp.lt.s32.totalorder %s346_s12, %s4403_s2 }
  0x61   : > { %p3641_p3 = scmp.ne.s32.totalorder %s346_s12, %s3640_s29  ;;  %p3647_p2 = scmp.lt.s32.totalorder %s3645_s19, %s3640_s29 }
  0x63   : > { %p3643_p10 = pnand %p3642_p5, %p3641_p3  ;;  %p3648_p0 = por %p3647_p2, %p3646_p13 }
  0x65   : > { %p3644_p8 = pneg %p3643_p10 }
  0x67   : > { %p3649_p6 = pnand %p3648_p0, %p3644_p8 }
  0x69   : > { %3652 = shalt.err (!%p3649_p6)
}
  0x6a   : > { %s3653_s4 = scalar_lea.vmem %s4084_s23, 256  ;;  %s3863_s7 = smov [#allocation6]  }
  0x6b   : > { %p3654_p4 = scmp.ne.s32.totalorder %s4084_s23, %s3653_s4  ;;  %s3658_s8 = sshll.u32 %s3863_s7, 4  ;;  %s3659_s8 = int_to_ptr.vmem [resolvable:$false] %s3658_s8 }
  0x6c   : > { %s3660_s20 = scalar_lea.vmem %s3659_s8, 512  ;;  %p3661_p10 = scmp.lt.s32.totalorder %s4084_s23, %s3659_s8 }
  0x6d   : > { %p3656_p12 = pnand %p3654_p4, %p3642_p5  ;;  %p3662_p11 = scmp.lt.s32.totalorder %s3660_s20, %s3653_s4 }
  0x6f   : > { %p3657_p3 = pneg %p3656_p12  ;;  %p3663_p9 = por %p3662_p11, %p3661_p10 }
  0x71   : > { %p3664_p1 = pnand %p3663_p9, %p3657_p3 }
  0x73   : > { %3667 = shalt.err (!%p3664_p1)
}
  0x74   : > { %3219 = dma.hbm_to_vmem [thread:$0]  (!%p4080_p7), %s346_s12, 256, %s4084_s23, %s336_s10  }
  0x75   : > { %s357_s6 = sand.u32 1, %s3836_s28   ;;  %s74_s27 = ssub.s32 %s4099_s18, %s4103_s21 }
  0x76   : > { %s2742_s11 = sshll.u32 %s357_s6, 4  ;;  %p75_p6 = scmp.eq.s32.totalorder %s74_s27, 0 }
  0x77   : > { %p4446_p8 = scmp.ne.s32.totalorder %s4444_s24, 0  ;;  %s4447_s19 = sadd.s32 1, %s3836_s28 }
  0x78   : > { %s4147_s26 = scalar_select %p75_p6, %s3836_s28, %s4447_s19  }
  0x79   : > { %s3187_s29 = scalar_select %p4446_p8, [#allocation5], [#allocation19] }
  0x7a   : > { %s3188_s14 = scalar_select %p4446_p8, %s3852_s13, 0 }
  0x7b   : > { %p4448_p9 = scmp.lt.s32.totalorder %s3852_s13, 3  ;;  %s359_s12 = scalar_lea.vmem [#allocation9], %s2742_s11 }
  0x7c   : > { %s368_s23 = sshll.u32 %s359_s12, 4  ;;  %s205_s10 = ssub.s32 %s3852_s13, %s4052_s15  ;;  %s4164_s23 = int_to_ptr.vmem [resolvable:$true] %s368_s23 }
  0x7d   : > { %s4496_s29 = smov (!%p4448_p9, %s3187_s29), [#allocation21]  ;;  %p4449_p2 = pmov %p4448_p9 }
  0x7e   : > { %p4168_p7 = scmp.eq.s32.totalorder %s205_s10, 0  ;;  %s208_s7 = sadd.s32 1, %s3824_s25 }
  0x7f   : > { %s4498_s14 = smov (!%p4449_p2, %s3188_s14), 0  ;;  %p4450_p4 = pmov %p4449_p2 }
  0x80   : > { %s360_s21 = sld [smem:[%s4496_s29 + %s4498_s14]]  ;;  %s4453_s27 = sand.u32 1, %s3852_s13  }
  0x81   : > { %p4160_p11 = pnand %p4450_p4, %p4446_p8  ;;  %s356_s11 = scalar_lea.sflag [#allocation10], %s4453_s27 }
  0x82   : > { %s4452_s4 = scalar_select %p4168_p7, 1, 0 }
  0x83   : > { %p3670_p13 = pneg %p4160_p11  ;;  %s3673_s12 = scalar_lea.hbm %s4404_s3, 768 }
  0x86   : > { %s2956_s8 = sshll.u32 %s360_s21, 8 }
  0x87   : > { %s366_s24 = scalar_lea.hbm %s4404_s3, %s2956_s8 }
  0x88   : > { %s3668_s19 = scalar_lea.hbm %s366_s24, 256  ;;  %p3674_p10 = scmp.lt.s32.totalorder %s366_s24, %s4404_s3 }
  0x89   : > { %p3669_p5 = scmp.ne.s32.totalorder %s366_s24, %s3668_s19  ;;  %p3675_p6 = scmp.lt.s32.totalorder %s3673_s12, %s3668_s19 }
  0x8b   : > { %p3671_p0 = pnand %p3670_p13, %p3669_p5  ;;  %p3676_p8 = por %p3675_p6, %p3674_p10 }
  0x8d   : > { %p3672_p3 = pneg %p3671_p0 }
  0x8f   : > { %p3677_p9 = pnand %p3676_p8, %p3672_p3 }
  0x91   : > { %3680 = shalt.err (!%p3677_p9)
}
  0x92   : > { %s3681_s8 = scalar_lea.vmem %s4164_s23, 256  ;;  %s3864_s20 = smov [#allocation9]  }
  0x93   : > { %p3682_p2 = scmp.ne.s32.totalorder %s4164_s23, %s3681_s8  ;;  %s3686_s6 = sshll.u32 %s3864_s20, 4  ;;  %s3687_s6 = int_to_ptr.vmem [resolvable:$false] %s3686_s6 }
  0x94   : > { %s3688_s27 = scalar_lea.vmem %s3687_s6, 512  ;;  %p3689_p0 = scmp.lt.s32.totalorder %s4164_s23, %s3687_s6 }
  0x95   : > { %p3684_p4 = pnand %p3682_p2, %p3670_p13  ;;  %p3690_p12 = scmp.lt.s32.totalorder %s3688_s27, %s3681_s8 }
  0x97   : > { %p3685_p5 = pneg %p3684_p4  ;;  %p3691_p1 = por %p3690_p12, %p3689_p0 }
  0x99   : > { %p3692_p7 = pnand %p3691_p1, %p3685_p5 }
  0x9b   : > { %3695 = shalt.err (!%p3692_p7)
}
  0x9c   : > { %3224 = dma.hbm_to_vmem [thread:$0]  (!%p4160_p11), %s366_s24, 256, %s4164_s23, %s356_s11  }
  0x9d   : > { %p4454_p12 = scmp.ne.s32.totalorder %s4452_s4, 0  ;;  %p4455_p7 = scmp.eq.s32.totalorder %s3852_s13, 0 }
  0x9e   : > { %p4456_p1 = scmp.ne.s32.totalorder %s3824_s25, %s3820_s1  ;;  %p4457_p3 = scmp.eq.s32.totalorder %s3987_s16, 0 }
  0x9f   : > { %s4201_s19 = scalar_select %p4454_p12, %s3824_s25, %s208_s7  }
  0xa0   : > { %p217_p13 = por %p4456_p1, %p4455_p7  ;;  %p4458_p10 = scmp.ne.s32.totalorder %s3820_s1, %s3816_s0 }
  0xa1   : > { %s375_s29 = sand.u32 1, %s3824_s25   ;;  %s2957_s14 = sshll.u32 %s3852_s13, 12 }
  0xa2   : > { %p4213_p6 = por %p4458_p10, %p4457_p3  ;;  %s2745_s12 = sshll.u32 %s375_s29, 8 }
  0xa3   : > { %s4222_s23 = scalar_lea.hbm %s4410_s9, %s2957_s14  ;;  %s379_s4 = scalar_lea.vmem [#allocation15], %s2745_s12 }
  0xa4   : > { %s4459_s18 = scalar_select %p4213_p6, 1, 0 }
  0xa5   : > { %s386_s7 = sshll.u32 %s379_s4, 4  ;;  %p4460_p11 = scmp.lt.s32.totalorder %s3852_s13, 3  ;;  %s4230_s7 = int_to_ptr.vmem [resolvable:$true] %s386_s7 }
  0xa6   : > { %s4232_s24 = scalar_lea.sflag [#allocation16], %s375_s29  ;;  %s3696_s11 = scalar_lea.hbm %s4222_s23, 4096 }
  0xa7   : > { %p4226_p8 = pnand %p4460_p11, %p217_p13  ;;  %p3697_p9 = scmp.ne.s32.totalorder %s4222_s23, %s3696_s11 }
  0xa8   : > { %s3701_s6 = scalar_lea.hbm %s4410_s9, 12288  ;;  %p3702_p0 = scmp.lt.s32.totalorder %s4222_s23, %s4410_s9 }
  0xa9   : > { %p3698_p2 = pneg %p4226_p8  ;;  %p3703_p12 = scmp.lt.s32.totalorder %s3701_s6, %s3696_s11 }
  0xab   : > { %p3699_p4 = pnand %p3698_p2, %p3697_p9  ;;  %p3704_p7 = por %p3703_p12, %p3702_p0 }
  0xad   : > { %p3700_p5 = pneg %p3699_p4 }
  0xaf   : > { %p3705_p1 = pnand %p3704_p7, %p3700_p5 }
  0xb1   : > { %3708 = shalt.err (!%p3705_p1)
}
  0xb2   : > { %s3709_s29 = scalar_lea.vmem %s4230_s7, 4096  ;;  %s3865_s14 = smov [#allocation15]  }
  0xb3   : > { %p3710_p13 = scmp.ne.s32.totalorder %s4230_s7, %s3709_s29  ;;  %s3714_s12 = sshll.u32 %s3865_s14, 4  ;;  %s3715_s12 = int_to_ptr.vmem [resolvable:$false] %s3714_s12 }
  0xb4   : > { %s3716_s10 = scalar_lea.vmem %s3715_s12, 8192  ;;  %p3717_p11 = scmp.lt.s32.totalorder %s4230_s7, %s3715_s12 }
  0xb5   : > { %p3712_p3 = pnand %p3710_p13, %p3698_p2  ;;  %p3718_p9 = scmp.lt.s32.totalorder %s3716_s10, %s3709_s29 }
  0xb7   : > { %p3713_p10 = pneg %p3712_p3  ;;  %p3719_p4 = por %p3718_p9, %p3717_p11 }
  0xb9   : > { %p3720_p6 = pnand %p3719_p4, %p3713_p10 }
  0xbb   : > { %3723 = shalt.err (!%p3720_p6)
}
  0xbc   : > { %s4462_s21 = smov 4   ;;  %s4463_s4 = smov 64  }
  0xbd   : > { %3227 = dma.hbm_to_vmem [thread:$0]  (!%p4226_p8), %s4222_s23, 4096, %s4230_s7, %s4232_s24, %s4463_s4, %s4463_s4, %s4462_s21  }
  0xbe   : > { %p4464_p2 = scmp.ne.s32.totalorder %s4435_s17, 0 }
  0xbf   : > { %s400_s11 = sand.u32 (!%p4464_p2), 1, %s3844_s30   ;;  %p4465_p6 = scmp.ne.s32.totalorder (!%p4464_p2), %s4441_s22, 0 }
  0xc0   : > { %398 = sbr.rel (%p4464_p2) target bundleno = 1000 (0x3e8), region = 56  ;;  %s4259_s8 = sshll.u32 (!%p4464_p2), %s400_s11, 4 }
  0xc1   : > { %s401_s20 = scalar_lea.sflag (!%p4464_p2), [#allocation7], %s400_s11  ;;  %s404_s6 = scalar_lea.vmem (!%p4464_p2), [#allocation6], %s4259_s8 }
  0xc5   : > { %3791 = dma.done.wait (%p4465_p6), %s401_s20, 256  }
  0xc6   : > { %3793 = vsyncadd (%p4465_p6), %s401_s20, 4294967040  ;;  %s4466_s0 = sld [smem:[#allocation29_spill]]  ;;  %s409_s23 = sand.u32 1, %s3987_s16  }
  0xc7   : > { %s410_s24 = scalar_lea.sflag [#allocation10], %s409_s23  ;;  %p4467_p8 = scmp.ne.s32.totalorder %s4445_s5, 0 }
  0xcc   : > { %s411_s7 = sand.u32 1, %s4466_s0  }
  0xcd   : > { %s4268_s17 = sshll.u32 %s411_s7, 4 }
  0xce   : > { %s413_s13 = scalar_lea.vmem [#allocation9], %s4268_s17 }
  0xcf   : > { %3795 = dma.done.wait (%p4467_p8), %s410_s24, 256  }
  0xd0   : > { %3797 = vsyncadd (%p4467_p8), %s410_s24, 4294967040  ;;  %p4468_p5 = scmp.eq.s32.totalorder %s3987_s16, 0 }
  0xd2   : > { %3799 = dma.done.wait (%p4468_p5), [#allocation10], 8192   ;;  %p4469_p0 = pmov %p4468_p5 }
  0xd4   : > { %3801 = vsyncadd (%p4469_p0), [#allocation10], 4294959104  ;;  %p4470_p12 = pmov %p4469_p0 }
  0xd5   : > { %p4471_p7 = pmov %p4469_p0 }
  0xd6   : > { %3803 = dma.done.wait (%p4470_p12), [#allocation13], 12288  }
  0xd7   : > { %3805 = vsyncadd (%p4471_p7), [#allocation13], 4294955008  ;;  %s430_s22 = sand.u32 1, %s3820_s1   ;;  %p4472_p1 = scmp.ne.s32.totalorder %s4459_s18, 0 }
  0xd8   : > { %s2754_s27 = sshll.u32 %s430_s22, 8  ;;  %s431_s29 = scalar_lea.sflag [#allocation16], %s430_s22 }
  0xd9   : > { %s4284_s14 = scalar_lea.vmem [#allocation15], %s2754_s27 }
  0xda   : > { %3807 = dma.done.wait (%p4472_p1), %s431_s29, 4096  }
  0xdb   : > { %3809 = vsyncadd (%p4472_p1), %s431_s29, 4294963200  ;;  %p4473_p13 = scmp.ne.s32.totalorder %s3987_s16, 0 }
  0xdd   : > { %481 = sbr.rel (%p4473_p13) target bundleno = 228 (0xe4), region = 84 }
  0xe2   : > { %v3866_v0 = vmov 0.0  }
  0xe3   : > { %482 = vst [vmem:[#allocation2] sm:$0x3] %v3866_v0 }
  0xe4 PF: > { %v3330_v1 = vld [vmem:[#allocation12 + $0x78] sm:$0xff]   ;;  %v3334_v5 = vld [vmem:[#allocation12 + $0x70] sm:$0xff]   ;;  %v3338_v9 = vld [vmem:[#allocation12 + $0x68] sm:$0xff]   ;;  %v491_v29 = vlaneseq  ;;  %v3867_v37 = vmov 1983009808   ;;  %s4474_s12 = sld [smem:[#allocation34_spill]] }
  0xe5   : > { %v3331_v2 = vld [vmem:[#allocation12 + $0xf8] sm:$0xff]   ;;  %2958 = vmatprep.subr.bf16.mxu0 %v3330_v1  ;;  %v3335_v6 = vld [vmem:[#allocation12 + $0xf0] sm:$0xff]   ;;  %v3339_v10 = vld [vmem:[#allocation12 + $0xe8] sm:$0xff]   ;;  %v489_v38 = vunpack.c.l.s4 %v3867_v37  ;;  %s4475_s4 = sld [smem:[#allocation36_spill]]  ;;  %p2949_p3 = scmp.ne.s32.totalorder %s3987_s16, 2 }
  0xe6   : > { %v3332_v3 = vld [vmem:[#allocation12 + $0x38] sm:$0xff]   ;;  %2980 = vmatprep.subr.bf16.mxu1 %v3331_v2  ;;  %v3336_v7 = vld [vmem:[#allocation12 + $0x30] sm:$0xff]   ;;  %v3340_v11 = vld [vmem:[#allocation12 + $0x28] sm:$0xff]   ;;  %v4292_v34 = vshrl.u32 %v491_v29, 7  ;;  %s4476_s20 = sld [smem:[#allocation37_spill]] (!%p2949_p3) }
  0xe7   : > { %v3333_v4 = vld [vmem:[#allocation12 + $0xb8] sm:$0xff]   ;;  %2959 = vmatpush3.bf16.msra.mxu0 %v3332_v3  ;;  %v3337_v8 = vld [vmem:[#allocation12 + $0xb0] sm:$0xff]   ;;  %v3341_v12 = vld [vmem:[#allocation12 + $0xa8] sm:$0xff]   ;;  %v490_v40 = vunpack.c.0.s8 %v489_v38 }
  0xe8   : > { %2981 = vmatpush3.bf16.msra.mxu1 %v3333_v4  ;;  %2960 = vmatprep.subr.bf16.mxu0 %v3334_v5  ;;  %v3342_v13 = vld [vmem:[#allocation12 + $0x60] sm:$0xff]   ;;  %v3346_v17 = vld [vmem:[#allocation12 + $0x58] sm:$0xff]   ;;  %v3350_v21 = vld [vmem:[#allocation12 + $0x50] sm:$0xff]  }
  0xe9   : > { %2982 = vmatprep.subr.bf16.mxu1 %v3335_v6  ;;  %v3343_v14 = vld [vmem:[#allocation12 + $0xe0] sm:$0xff]   ;;  %v3347_v18 = vld [vmem:[#allocation12 + $0xd8] sm:$0xff]   ;;  %v3351_v22 = vld [vmem:[#allocation12 + $0xd0] sm:$0xff]   ;;  %v4297_v42 = vsub.s32 %v490_v40, %v4292_v34 }
  0xea   : > { %v3344_v15 = vld [vmem:[#allocation12 + $0x20] sm:$0xff]   ;;  %v3348_v19 = vld [vmem:[#allocation12 + $0x18] sm:$0xff]   ;;  %v3352_v23 = vld [vmem:[#allocation12 + $0x10] sm:$0xff]  }
  0xeb   : > { %2961 = vmatpush3.bf16.msra.mxu0 %v3336_v7  ;;  %v3345_v16 = vld [vmem:[#allocation12 + $0xa0] sm:$0xff]   ;;  %v3349_v20 = vld [vmem:[#allocation12 + $0x98] sm:$0xff]   ;;  %v3353_v24 = vld [vmem:[#allocation12 + $0x90] sm:$0xff]  }
  0xec   : > { %2983 = vmatpush3.bf16.msra.mxu1 %v3337_v8  ;;  %2962 = vmatprep.subr.bf16.mxu0 %v3338_v9  ;;  %v3354_v25 = vld [vmem:[#allocation12 + $0x48] sm:$0xff]   ;;  %v3358_v30 = vld [vmem:[#allocation12 + $0x40] sm:$0xff]   ;;  %v3363_v36 = vld [vmem:[#allocation12 + $0x178] sm:$0xff]  }
  0xed   : > { %2984 = vmatprep.subr.bf16.mxu1 %v3339_v10  ;;  %v3355_v26 = vld [vmem:[#allocation12 + $0xc8] sm:$0xff]   ;;  %v3359_v31 = vld [vmem:[#allocation12 + $0xc0] sm:$0xff]   ;;  %v3364_v39 = vld [vmem:[#allocation12 + $0x1f8] sm:$0xff]  }
  0xee   : > { %v3356_v27 = vld [vmem:[#allocation12 + $0x8] sm:$0xff]   ;;  %v3360_v32 = vld [vmem:[#allocation12] sm:$0xff]   ;;  %v3365_v47 = vld [vmem:[#allocation12 + $0x138] sm:$0xff]  }
  0xef   : > { %2963 = vmatpush3.bf16.msra.mxu0 %v3340_v11  ;;  %v3357_v28 = vld [vmem:[#allocation12 + $0x88] sm:$0xff]   ;;  %v3361_v33 = vld [vmem:[#allocation12 + $0x80] sm:$0xff]   ;;  %v3366_v50 = vld [vmem:[#allocation12 + $0x1b8] sm:$0xff]  }
  0xf0   : > { %2985 = vmatpush3.bf16.msra.mxu1 %v3341_v12  ;;  %2964 = vmatprep.subr.bf16.mxu0 %v3342_v13  ;;  %v537_v35 = vld [vmem:[%s413_s13] sm:$0xff]  ;;  %v3371_v57 = vld [vmem:[#allocation12 + $0x168] sm:$0xff]   ;;  %v3379_v1 = vld [vmem:[#allocation12 + $0x158] sm:$0xff]  }
  0xf1   : > { %2986 = vmatprep.subr.bf16.mxu1 %v3343_v14  ;;  %v541_v41 = vcombine.high %v537_v35, %v537_v35  ;;  %v548_v43 = vrot.slane %v537_v35, %v4297_v42  ;;  %v3367_v53 = vld [vmem:[#allocation12 + $0x170] sm:$0xff]   ;;  %v3372_v58 = vld [vmem:[#allocation12 + $0x1e8] sm:$0xff]   ;;  %v3375_v61 = vld [vmem:[#allocation12 + $0x160] sm:$0xff]  }
  0xf2   : > { %v3368_v54 = vld [vmem:[#allocation12 + $0x1f0] sm:$0xff]   ;;  %v3373_v59 = vld [vmem:[#allocation12 + $0x128] sm:$0xff]   ;;  %v3376_v62 = vld [vmem:[#allocation12 + $0x1e0] sm:$0xff]  }
  0xf3   : > { %2965 = vmatpush3.bf16.msra.mxu0 %v3344_v15  ;;  %v555_v44 = vrot.slane %v541_v41, %v4297_v42  ;;  %v556_v45 = vcombine.high %v548_v43, %v548_v43  ;;  %v583_v48 = vpack.c.bf16 %v548_v43, %v548_v43  ;;  %v3369_v55 = vld [vmem:[#allocation12 + $0x130] sm:$0xff]   ;;  %v3374_v60 = vld [vmem:[#allocation12 + $0x1a8] sm:$0xff]   ;;  %v3377_v63 = vld [vmem:[#allocation12 + $0x120] sm:$0xff]  }
  0xf4   : > { %2987 = vmatpush3.bf16.msra.mxu1 %v3345_v16  ;;  %2966 = vmatprep.subr.bf16.mxu0 %v3346_v17  ;;  %v3370_v56 = vld [vmem:[#allocation12 + $0x1b0] sm:$0xff]   ;;  %v3378_v0 = vld [vmem:[#allocation12 + $0x1a0] sm:$0xff]   ;;  %v3380_v2 = vld [vmem:[#allocation12 + $0x1d8] sm:$0xff]  }
  0xf5   : > { %2988 = vmatprep.subr.bf16.mxu1 %v3347_v18  ;;  %v557_v46 = vcombine.high %v555_v44, %v555_v44  ;;  %v585_v49 = vpack.c.bf16 %v555_v44, %v555_v44  ;;  %v584_v51 = vpack.c.bf16 %v556_v45, %v556_v45  ;;  %v3381_v3 = vld [vmem:[#allocation12 + $0x118] sm:$0xff]   ;;  %v3383_v5 = vld [vmem:[#allocation12 + $0x150] sm:$0xff]   ;;  %v3387_v9 = vld [vmem:[#allocation12 + $0x148] sm:$0xff]  }
  0xf6   : > { %v3382_v4 = vld [vmem:[#allocation12 + $0x198] sm:$0xff]   ;;  %v3384_v6 = vld [vmem:[#allocation12 + $0x1d0] sm:$0xff]   ;;  %v3388_v10 = vld [vmem:[#allocation12 + $0x1c8] sm:$0xff]  }
  0xf7   : > { %2967 = vmatpush3.bf16.msra.mxu0 %v3348_v19  ;;  %v586_v52 = vpack.c.bf16 %v557_v46, %v557_v46  ;;  %1263 = vmatprep.mubr.bf16.mxu0 %v584_v51  ;;  %v3385_v7 = vld [vmem:[#allocation12 + $0x110] sm:$0xff]   ;;  %v538_v11 = vld [vmem:[%s413_s13 + $0x8] sm:$0xff]  ;;  %v3391_v16 = vld [vmem:[#allocation12 + $0x140] sm:$0xff]  }
  0xf8   : > { %2989 = vmatpush3.bf16.msra.mxu1 %v3349_v20  ;;  %2968 = vmatprep.subr.bf16.mxu0 %v3350_v21  ;;  %v3386_v8 = vld [vmem:[#allocation12 + $0x190] sm:$0xff]   ;;  %v3389_v12 = vld [vmem:[#allocation12 + $0x108] sm:$0xff]   ;;  %v565_v13 = vrot.slane %v538_v11, %v4297_v42  ;;  %v558_v14 = vcombine.high %v538_v11, %v538_v11  ;;  %v3392_v19 = vld [vmem:[#allocation12 + $0x1c0] sm:$0xff]  }
  0xf9   : > { %2990 = vmatprep.subr.bf16.mxu1 %v3351_v22  ;;  %1303 = vmatprep.mubr.bf16.mxu1 %v586_v52  ;;  %v3390_v15 = vld [vmem:[#allocation12 + $0x188] sm:$0xff]   ;;  %v3393_v20 = vld [vmem:[#allocation12 + $0x100] sm:$0xff]   ;;  %v3403_v35 = vld [vmem:[#allocation11 + $0xb0] sm:$0xff]  }
  0xfa   : > { %v573_v17 = vcombine.high %v565_v13, %v565_v13  ;;  %v572_v18 = vrot.slane %v558_v14, %v4297_v42  ;;  %v3405_v37 = vld [vmem:[#allocation11 + $0xe8] sm:$0xff]   ;;  %v3408_v40 = vld [vmem:[#allocation11 + $0x60] sm:$0xff]   ;;  %v3412_v45 = vld [vmem:[#allocation11 + $0x58] sm:$0xff]  }
  0xfb   : > { %2969 = vmatpush3.bf16.msra.mxu0 %v3352_v23  ;;  %v3394_v23 = vld [vmem:[#allocation12 + $0x180] sm:$0xff]   ;;  %v3406_v38 = vld [vmem:[#allocation11 + $0x28] sm:$0xff]   ;;  %v3413_v46 = vld [vmem:[#allocation11 + $0xd8] sm:$0xff]  }
  0xfc   : > { %2991 = vmatpush3.bf16.msra.mxu1 %v3353_v24  ;;  %2970 = vmatprep.subr.bf16.mxu0 %v3354_v25  ;;  %v588_v21 = vpack.c.bf16 %v573_v17, %v573_v17  ;;  %v574_v22 = vcombine.high %v572_v18, %v572_v18  ;;  %v3396_v25 = vld [vmem:[#allocation11 + $0x78] sm:$0xff]   ;;  %v589_v29 = vpack.c.bf16 %v572_v18, %v572_v18  ;;  %v3409_v41 = vld [vmem:[#allocation11 + $0xe0] sm:$0xff]   ;;  %v3418_v51 = vld [vmem:[#allocation11 + $0x10] sm:$0xff]  }
  0xfd   : > { %2992 = vmatprep.subr.bf16.mxu1 %v3355_v26  ;;  %v3397_v26 = vld [vmem:[#allocation11 + $0xf8] sm:$0xff]   ;;  %v3410_v43 = vld [vmem:[#allocation11 + $0x20] sm:$0xff]   ;;  %v3419_v52 = vld [vmem:[#allocation11 + $0x90] sm:$0xff]  }
  0xfe   : > { %v590_v24 = vpack.c.bf16 %v574_v22, %v574_v22  ;;  %v3411_v44 = vld [vmem:[#allocation11 + $0xa0] sm:$0xff]   ;;  %v3433_v11 = vld [vmem:[#allocation11 + $0x170] sm:$0xff]   ;;  %v3439_v17 = vld [vmem:[#allocation11 + $0x128] sm:$0xff]  }
  0xff   : > { %2971 = vmatpush3.bf16.msra.mxu0 %v3356_v27  ;;  %v3398_v27 = vld [vmem:[#allocation11 + $0x38] sm:$0xff]   ;;  %v3436_v14 = vld [vmem:[#allocation11 + $0x1b0] sm:$0xff]   ;;  %v3440_v18 = vld [vmem:[#allocation11 + $0x1a8] sm:$0xff]  }
 0x100   : > { %2993 = vmatpush3.bf16.msra.mxu1 %v3357_v28  ;;  %2972 = vmatprep.subr.bf16.mxu0 %v3358_v30  ;;  %v587_v28 = vpack.c.bf16 %v565_v13, %v565_v13  ;;  %v3399_v30 = vld [vmem:[#allocation11 + $0xb8] sm:$0xff]   ;;  %v3435_v13 = vld [vmem:[#allocation11 + $0x130] sm:$0xff]   ;;  %v3444_v22 = vld [vmem:[#allocation11 + $0x1a0] sm:$0xff]  }
 0x101   : > { %2994 = vmatprep.subr.bf16.mxu1 %v3359_v31  ;;  %v3400_v31 = vld [vmem:[#allocation11 + $0x70] sm:$0xff]  }
 0x103   : > { %2973 = vmatpush3.bf16.msra.mxu0 %v3360_v32  ;;  %v3401_v32 = vld [vmem:[#allocation11 + $0xf0] sm:$0xff]  }
 0x104   : > { %2995 = vmatpush3.bf16.msra.mxu1 %v3361_v33  ;;  %3002 = vmatprep.subr.bf16.mxu0 %v3363_v36  ;;  %v3402_v33 = vld [vmem:[#allocation11 + $0x30] sm:$0xff]   ;;  %v3404_v36 = vld [vmem:[#allocation11 + $0x68] sm:$0xff]  }
 0x105   : > { %3024 = vmatprep.subr.bf16.mxu1 %v3364_v39  ;;  %v3407_v39 = vld [vmem:[#allocation11 + $0xa8] sm:$0xff]  }
 0x106   : > { %1264 = vmatmul.mubr.bf16.vlgmr.msra.gmra.mxu0 %v583_v48  ;;  %v3415_v48 = vld [vmem:[#allocation11 + $0x98] sm:$0xff]  }
 0x107   : > { %1304 = vmatmul.mubr.bf16.vlgmr.msra.gmra.mxu1 %v585_v49  ;;  %3003 = vmatpush3.bf16.msra.mxu0 %v3365_v47  ;;  %v3414_v47 = vld [vmem:[#allocation11 + $0x18] sm:$0xff]   ;;  %v3416_v49 = vld [vmem:[#allocation11 + $0x50] sm:$0xff]  }
 0x108   : > { %3025 = vmatpush3.bf16.msra.mxu1 %v3366_v50  ;;  %3004 = vmatprep.subr.bf16.mxu0 %v3367_v53  ;;  %v3417_v50 = vld [vmem:[#allocation11 + $0xd0] sm:$0xff]   ;;  %v3420_v53 = vld [vmem:[#allocation11 + $0x48] sm:$0xff]  }
 0x109   : > { %3026 = vmatprep.subr.bf16.mxu1 %v3368_v54  ;;  %1343 = vmatprep.mubr.bf16.mxu0 %v588_v21  ;;  %v3421_v54 = vld [vmem:[#allocation11 + $0xc8] sm:$0xff]   ;;  %v3443_v21 = vld [vmem:[#allocation11 + $0x120] sm:$0xff]  }
 0x10a   : > { %1383 = vmatprep.mubr.bf16.mxu1 %v590_v24  ;;  %v3446_v24 = vld [vmem:[#allocation11 + $0x1d8] sm:$0xff]  }
 0x10b   : > { %3005 = vmatpush3.bf16.msra.mxu0 %v3369_v55  ;;  %v483_v55 = vld [vmem:[%s404_s6] sm:$0xff] }
 0x10c   : > { %3027 = vmatpush3.bf16.msra.mxu1 %v3370_v56  ;;  %3006 = vmatprep.subr.bf16.mxu0 %v3371_v57  ;;  %v3422_v56 = vld [vmem:[#allocation11 + $0x8] sm:$0xff]   ;;  %v494_v57 = vrot.slane %v483_v55, %v4297_v42 }
 0x10d   : > { %3028 = vmatprep.subr.bf16.mxu1 %v3372_v58  ;;  %v487_v58 = vcombine.high %v483_v55, %v483_v55  ;;  %v3473_v55 = vld [vmem:[#allocation14 + $0xcc] ss:$16 sps:$4 sm:$0xff]  }
 0x10f   : > { %3007 = vmatpush3.bf16.msra.mxu0 %v3373_v59  ;;  %v3423_v59 = vld [vmem:[#allocation11 + $0x88] sm:$0xff]  }
 0x110   : > { %3029 = vmatpush3.bf16.msra.mxu1 %v3374_v60  ;;  %3008 = vmatprep.subr.bf16.mxu0 %v3375_v61  ;;  %v3424_v60 = vld [vmem:[#allocation11 + $0x40] sm:$0xff]   ;;  %v502_v61 = vcombine.high %v494_v57, %v494_v57 }
 0x111   : > { %3030 = vmatprep.subr.bf16.mxu1 %v3376_v62  ;;  %v501_v62 = vrot.slane %v487_v58, %v4297_v42  ;;  %v3476_v58 = vld [vmem:[#allocation14 + $0xa4] ss:$16 sps:$4 sm:$0xff]  }
 0x113   : > { %3009 = vmatpush3.bf16.msra.mxu0 %v3377_v63  ;;  %v3425_v63 = vld [vmem:[#allocation11 + $0xc0] sm:$0xff]  }
 0x114   : > { %3031 = vmatpush3.bf16.msra.mxu1 %v3378_v0  ;;  %3010 = vmatprep.subr.bf16.mxu0 %v3379_v1  ;;  %v3426_v0 = vld [vmem:[#allocation11] sm:$0xff]   ;;  %v530_v1 = vpack.c.bf16 %v502_v61, %v502_v61  ;;  %v3477_v61 = vld [vmem:[#allocation14 + $0xa8] ss:$16 sps:$4 sm:$0xff]  }
 0x115   : > { %3032 = vmatprep.subr.bf16.mxu1 %v3380_v2  ;;  %v503_v2 = vcombine.high %v501_v62, %v501_v62 }
 0x117   : > { %3011 = vmatpush3.bf16.msra.mxu0 %v3381_v3  ;;  %v3427_v3 = vld [vmem:[#allocation11 + $0x80] sm:$0xff]  }
 0x118   : > { %3033 = vmatpush3.bf16.msra.mxu1 %v3382_v4  ;;  %3012 = vmatprep.subr.bf16.mxu0 %v3383_v5  ;;  %v532_v4 = vpack.c.bf16 %v503_v2, %v503_v2  ;;  %v3429_v5 = vld [vmem:[#allocation11 + $0x178] sm:$0xff]   ;;  %v3488_v2 = vld [vmem:[#allocation14 + $0x64] ss:$16 sps:$4 sm:$0xff]  }
 0x119   : > { %3034 = vmatprep.subr.bf16.mxu1 %v3384_v6  ;;  %v3430_v6 = vld [vmem:[#allocation11 + $0x1f8] sm:$0xff]  }
 0x11b   : > { %3013 = vmatpush3.bf16.msra.mxu0 %v3385_v7  ;;  %v3431_v7 = vld [vmem:[#allocation11 + $0x138] sm:$0xff]  }
 0x11c   : > { %3035 = vmatpush3.bf16.msra.mxu1 %v3386_v8  ;;  %3014 = vmatprep.subr.bf16.mxu0 %v3387_v9  ;;  %v529_v8 = vpack.c.bf16 %v494_v57, %v494_v57  ;;  %v531_v9 = vpack.c.bf16 %v501_v62, %v501_v62  ;;  %v3471_v57 = vld [vmem:[#allocation14 + $0xc8] ss:$16 sps:$4 sm:$0xff]   ;;  %v3482_v62 = vld [vmem:[#allocation14 + $0x84] ss:$16 sps:$4 sm:$0xff]  }
 0x11d   : > { %3036 = vmatprep.subr.bf16.mxu1 %v3388_v10  ;;  %v3432_v10 = vld [vmem:[#allocation11 + $0x1b8] sm:$0xff]  }
 0x11f   : > { %3015 = vmatpush3.bf16.msra.mxu0 %v3389_v12  ;;  %v3434_v12 = vld [vmem:[#allocation11 + $0x1f0] sm:$0xff]  }
 0x120   : > { %3037 = vmatpush3.bf16.msra.mxu1 %v3390_v15  ;;  %3016 = vmatprep.subr.bf16.mxu0 %v3391_v16  ;;  %v3437_v15 = vld [vmem:[#allocation11 + $0x168] sm:$0xff]  }
 0x121   : > { %3038 = vmatprep.subr.bf16.mxu1 %v3392_v19  ;;  %v3438_v16 = vld [vmem:[#allocation11 + $0x1e8] sm:$0xff]   ;;  %v3441_v19 = vld [vmem:[#allocation11 + $0x160] sm:$0xff]  }
 0x123   : > { %3017 = vmatpush3.bf16.msra.mxu0 %v3393_v20  ;;  %v3442_v20 = vld [vmem:[#allocation11 + $0x1e0] sm:$0xff]  }
 0x124   : > { %3039 = vmatpush3.bf16.msra.mxu1 %v3394_v23  ;;  %3046 = vmatprep.subr.bf16.mxu0 %v3396_v25  ;;  %v3445_v23 = vld [vmem:[#allocation11 + $0x158] sm:$0xff]  }
 0x125   : > { %3068 = vmatprep.subr.bf16.mxu1 %v3397_v26  ;;  %v3447_v25 = vld [vmem:[#allocation11 + $0x118] sm:$0xff]  }
 0x126   : > { %1344 = vmatmul.mubr.bf16.vlgmr.msra.gmra.mxu0 %v587_v28  ;;  %v3448_v26 = vld [vmem:[#allocation11 + $0x198] sm:$0xff]   ;;  %v3450_v28 = vld [vmem:[#allocation11 + $0x1d0] sm:$0xff]  }
 0x127   : > { %1384 = vmatmul.mubr.bf16.vlgmr.msra.gmra.mxu1 %v589_v29  ;;  %3047 = vmatpush3.bf16.msra.mxu0 %v3398_v27  ;;  %v3449_v27 = vld [vmem:[#allocation11 + $0x150] sm:$0xff]  }
 0x128   : > { %3069 = vmatpush3.bf16.msra.mxu1 %v3399_v30  ;;  %3048 = vmatprep.subr.bf16.mxu0 %v3400_v31  ;;  %v3451_v29 = vld [vmem:[#allocation11 + $0x110] sm:$0xff]   ;;  %v3453_v31 = vld [vmem:[#allocation11 + $0x148] sm:$0xff]  }
 0x129   : > { %3070 = vmatprep.subr.bf16.mxu1 %v3401_v32  ;;  %1807 = vmatprep.mubr.bf16.mxu0 %v530_v1  ;;  %v3452_v30 = vld [vmem:[#allocation11 + $0x190] sm:$0xff]   ;;  %v3454_v32 = vld [vmem:[#allocation11 + $0x1c8] sm:$0xff]  }
 0x12a   : > { %1847 = vmatprep.mubr.bf16.mxu1 %v532_v4  ;;  %v3483_v1 = vld [vmem:[#allocation14 + $0x88] ss:$16 sps:$4 sm:$0xff]   ;;  %v3486_v4 = vld [vmem:[#allocation14 + $0x60] ss:$16 sps:$4 sm:$0xff]  }
 0x12b   : > { %3049 = vmatpush3.bf16.msra.mxu0 %v3402_v33  ;;  %v3455_v33 = vld [vmem:[#allocation11 + $0x108] sm:$0xff]  }
 0x12c   : > { %3071 = vmatpush3.bf16.msra.mxu1 %v3403_v35  ;;  %3050 = vmatprep.subr.bf16.mxu0 %v3404_v36  ;;  %v3456_v35 = vld [vmem:[#allocation11 + $0x188] sm:$0xff]  }
 0x12d   : > { %3072 = vmatprep.subr.bf16.mxu1 %v3405_v37  ;;  %v484_v36 = vld [vmem:[%s404_s6 + $0x8] sm:$0xff]  ;;  %v3457_v37 = vld [vmem:[#allocation11 + $0x140] sm:$0xff]  }
 0x12f   : > { %3051 = vmatpush3.bf16.msra.mxu0 %v3406_v38  ;;  %v3458_v38 = vld [vmem:[#allocation11 + $0x1c0] sm:$0xff]  }
 0x130   : > { %3073 = vmatpush3.bf16.msra.mxu1 %v3407_v39  ;;  %3052 = vmatprep.subr.bf16.mxu0 %v3408_v40  ;;  %v511_v39 = vrot.slane %v484_v36, %v4297_v42  ;;  %v504_v40 = vcombine.high %v484_v36, %v484_v36 }
 0x131   : > { %3074 = vmatprep.subr.bf16.mxu1 %v3409_v41 }
 0x132   : > { %v519_v41 = vcombine.high %v511_v39, %v511_v39 }
 0x133   : > { %3053 = vmatpush3.bf16.msra.mxu0 %v3410_v43  ;;  %v518_v43 = vrot.slane %v504_v40, %v4297_v42  ;;  %v3465_v42 = vld [vmem:[#allocation14 + $0xe8] ss:$16 sps:$4 sm:$0xff]  }
 0x134   : > { %3075 = vmatpush3.bf16.msra.mxu1 %v3411_v44  ;;  %3054 = vmatprep.subr.bf16.mxu0 %v3412_v45  ;;  %v3459_v44 = vld [vmem:[#allocation11 + $0x100] sm:$0xff]  }
 0x135   : > { %3076 = vmatprep.subr.bf16.mxu1 %v3413_v46  ;;  %v3460_v45 = vld [vmem:[#allocation11 + $0x180] sm:$0xff]   ;;  %v534_v46 = vpack.c.bf16 %v519_v41, %v519_v41 }
 0x137   : > { %3055 = vmatpush3.bf16.msra.mxu0 %v3414_v47  ;;  %v520_v47 = vcombine.high %v518_v43, %v518_v43 }
 0x138   : > { %3077 = vmatpush3.bf16.msra.mxu1 %v3415_v48  ;;  %3056 = vmatprep.subr.bf16.mxu0 %v3416_v49  ;;  %v533_v49 = vpack.c.bf16 %v511_v39, %v511_v39 }
 0x139   : > { %3078 = vmatprep.subr.bf16.mxu1 %v3417_v50  ;;  %v536_v48 = vpack.c.bf16 %v520_v47, %v520_v47  ;;  %v535_v50 = vpack.c.bf16 %v518_v43, %v518_v43 }
 0x13b   : > { %3057 = vmatpush3.bf16.msra.mxu0 %v3418_v51  ;;  %v3462_v51 = vld [vmem:[#allocation14 + $0xe0] ss:$16 sps:$4 sm:$0xff]  }
 0x13c   : > { %3079 = vmatpush3.bf16.msra.mxu1 %v3419_v52  ;;  %3058 = vmatprep.subr.bf16.mxu0 %v3420_v53  ;;  %v3464_v52 = vld [vmem:[#allocation14 + $0xe4] ss:$16 sps:$4 sm:$0xff]   ;;  %v3467_v53 = vld [vmem:[#allocation14 + $0xec] ss:$16 sps:$4 sm:$0xff]  }
 0x13d   : > { %3080 = vmatprep.subr.bf16.mxu1 %v3421_v54  ;;  %v3470_v54 = vld [vmem:[#allocation14 + $0xc4] ss:$16 sps:$4 sm:$0xff]  }
 0x13f   : > { %3059 = vmatpush3.bf16.msra.mxu0 %v3422_v56  ;;  %v3468_v56 = vld [vmem:[#allocation14 + $0xc0] ss:$16 sps:$4 sm:$0xff]  }
 0x140   : > { %3081 = vmatpush3.bf16.msra.mxu1 %v3423_v59  ;;  %3060 = vmatprep.subr.bf16.mxu0 %v3424_v60  ;;  %v3479_v59 = vld [vmem:[#allocation14 + $0xac] ss:$16 sps:$4 sm:$0xff]   ;;  %v3474_v60 = vld [vmem:[#allocation14 + $0xa0] ss:$16 sps:$4 sm:$0xff]  }
 0x141   : > { %3082 = vmatprep.subr.bf16.mxu1 %v3425_v63  ;;  %v3485_v63 = vld [vmem:[#allocation14 + $0x8c] ss:$16 sps:$4 sm:$0xff]  }
 0x143   : > { %3061 = vmatpush3.bf16.msra.mxu0 %v3426_v0  ;;  %v3480_v0 = vld [vmem:[#allocation14 + $0x80] ss:$16 sps:$4 sm:$0xff]  }
 0x144   : > { %3083 = vmatpush3.bf16.msra.mxu1 %v3427_v3  ;;  %3090 = vmatprep.subr.bf16.mxu0 %v3429_v5  ;;  %v3491_v3 = vld [vmem:[#allocation14 + $0x6c] ss:$16 sps:$4 sm:$0xff]   ;;  %v3489_v5 = vld [vmem:[#allocation14 + $0x68] ss:$16 sps:$4 sm:$0xff]  }
 0x145   : > { %3112 = vmatprep.subr.bf16.mxu1 %v3430_v6  ;;  %v3494_v6 = vld [vmem:[#allocation14 + $0x44] ss:$16 sps:$4 sm:$0xff]  }
 0x146   : > { %1808 = vmatmul.mubr.bf16.vlgmr.msra.gmra.mxu0 %v529_v8  ;;  %v3492_v8 = vld [vmem:[#allocation14 + $0x40] ss:$16 sps:$4 sm:$0xff]  }
 0x147   : > { %1848 = vmatmul.mubr.bf16.vlgmr.msra.gmra.mxu1 %v531_v9  ;;  %3091 = vmatpush3.bf16.msra.mxu0 %v3431_v7  ;;  %v3497_v7 = vld [vmem:[#allocation14 + $0x4c] ss:$16 sps:$4 sm:$0xff]   ;;  %v3495_v9 = vld [vmem:[#allocation14 + $0x48] ss:$16 sps:$4 sm:$0xff]  }
 0x148   : > { %3113 = vmatpush3.bf16.msra.mxu1 %v3432_v10  ;;  %3092 = vmatprep.subr.bf16.mxu0 %v3433_v11  ;;  %v3500_v10 = vld [vmem:[#allocation14 + $0x24] ss:$16 sps:$4 sm:$0xff]   ;;  %v3503_v11 = vld [vmem:[#allocation14 + $0x2c] ss:$16 sps:$4 sm:$0xff]  }
 0x149   : > { %3114 = vmatprep.subr.bf16.mxu1 %v3434_v12  ;;  %1887 = vmatprep.mubr.bf16.mxu0 %v534_v46  ;;  %v3498_v12 = vld [vmem:[#allocation14 + $0x20] ss:$16 sps:$4 sm:$0xff]  }
 0x14a   : > { %1927 = vmatprep.mubr.bf16.mxu1 %v536_v48 }
 0x14b   : > { %3093 = vmatpush3.bf16.msra.mxu0 %v3435_v13  ;;  %v3501_v13 = vld [vmem:[#allocation14 + $0x28] ss:$16 sps:$4 sm:$0xff]  }
 0x14c   : > { %3115 = vmatpush3.bf16.msra.mxu1 %v3436_v14  ;;  %3094 = vmatprep.subr.bf16.mxu0 %v3437_v15  ;;  %v3506_v14 = vld [vmem:[#allocation14 + $0x4] ss:$16 sps:$4 sm:$0xff]   ;;  %v3509_v15 = vld [vmem:[#allocation14 + $0xc] ss:$16 sps:$4 sm:$0xff]  }
 0x14d   : > { %3116 = vmatprep.subr.bf16.mxu1 %v3438_v16  ;;  %v3504_v16 = vld [vmem:[#allocation14] ss:$16 sps:$4 sm:$0xff]  }
 0x14f   : > { %3095 = vmatpush3.bf16.msra.mxu0 %v3439_v17  ;;  %v3507_v17 = vld [vmem:[#allocation14 + $0x8] ss:$16 sps:$4 sm:$0xff]  }
 0x150   : > { %3117 = vmatpush3.bf16.msra.mxu1 %v3440_v18  ;;  %3096 = vmatprep.subr.bf16.mxu0 %v3441_v19  ;;  %v3868_v18 = vmov 0   ;;  %v3510_v19 = vld [vmem:[%s4284_s14 + $0x78] sm:$0xff]  }
 0x151   : > { %3118 = vmatprep.subr.bf16.mxu1 %v3442_v20  ;;  %v3511_v20 = vld [vmem:[%s4284_s14 + $0xf8] sm:$0xff]  }
 0x153   : > { %3097 = vmatpush3.bf16.msra.mxu0 %v3443_v21 }
 0x154   : > { %3119 = vmatpush3.bf16.msra.mxu1 %v3444_v22  ;;  %3098 = vmatprep.subr.bf16.mxu0 %v3445_v23 }
 0x155   : > { %3120 = vmatprep.subr.bf16.mxu1 %v3446_v24 }
 0x157   : > { %3099 = vmatpush3.bf16.msra.mxu0 %v3447_v25 }
 0x158   : > { %3121 = vmatpush3.bf16.msra.mxu1 %v3448_v26  ;;  %3100 = vmatprep.subr.bf16.mxu0 %v3449_v27 }
 0x159   : > { %3122 = vmatprep.subr.bf16.mxu1 %v3450_v28 }
 0x15b   : > { %3101 = vmatpush3.bf16.msra.mxu0 %v3451_v29 }
 0x15c   : > { %3123 = vmatpush3.bf16.msra.mxu1 %v3452_v30  ;;  %3102 = vmatprep.subr.bf16.mxu0 %v3453_v31 }
 0x15d   : > { %3124 = vmatprep.subr.bf16.mxu1 %v3454_v32 }
 0x15f   : > { %3103 = vmatpush3.bf16.msra.mxu0 %v3455_v33 }
 0x160   : > { %3125 = vmatpush3.bf16.msra.mxu1 %v3456_v35  ;;  %3104 = vmatprep.subr.bf16.mxu0 %v3457_v37 }
 0x161   : > { %3126 = vmatprep.subr.bf16.mxu1 %v3458_v38 }
 0x163   : > { %3105 = vmatpush3.bf16.msra.mxu0 %v3459_v44 }
 0x164   : > { %3127 = vmatpush3.bf16.msra.mxu1 %v3460_v45  ;;  %2159 = vmatprep.subr.bf16.mxu0 %v3464_v52 }
 0x165   : > { %2200 = vmatprep.subr.bf16.mxu1 %v3467_v53 }
 0x166   : > { %1888 = vmatmul.mubr.bf16.vlgmr.msra.gmra.mxu0 %v533_v49 }
 0x167   : > { %1928 = vmatmul.mubr.bf16.vlgmr.msra.gmra.mxu1 %v535_v50  ;;  %2160 = vmatpush1.bf16.msra.mxu0 %v3462_v51 }
 0x168   : > { %2201 = vmatpush1.bf16.msra.mxu1 %v3465_v42  ;;  %2161 = vmatprep.subr.bf16.mxu0 %v3470_v54 }
 0x169   : > { %2202 = vmatprep.subr.bf16.mxu1 %v3473_v55  ;;  %2191 = vmatprep.mubr.bf16.mxu0 %v3868_v18 }
 0x16a   : > { %2232 = vmatprep.mubr.bf16.mxu1 %v3868_v18  ;;  %v3521_v18 = vld [vmem:[%s4284_s14 + $0xa8] sm:$0xff]  }
 0x16b   : > { %2162 = vmatpush1.bf16.msra.mxu0 %v3468_v56 }
 0x16c   : > { %2203 = vmatpush1.bf16.msra.mxu1 %v3471_v57  ;;  %2163 = vmatprep.subr.bf16.mxu0 %v3476_v58 }
 0x16d   : > { %2204 = vmatprep.subr.bf16.mxu1 %v3479_v59 }
 0x16f   : > { %2164 = vmatpush1.bf16.msra.mxu0 %v3474_v60 }
 0x170   : > { %2205 = vmatpush1.bf16.msra.mxu1 %v3477_v61  ;;  %2165 = vmatprep.subr.bf16.mxu0 %v3482_v62 }
 0x171   : > { %2206 = vmatprep.subr.bf16.mxu1 %v3485_v63 }
 0x173   : > { %2166 = vmatpush1.bf16.msra.mxu0 %v3480_v0 }
 0x174   : > { %2207 = vmatpush1.bf16.msra.mxu1 %v3483_v1  ;;  %2167 = vmatprep.subr.bf16.mxu0 %v3488_v2  ;;  %v2884_v2 = vld [vmem:[%s4474_s12] ss:$0 sm:$0xff] }
 0x175   : > { %2208 = vmatprep.subr.bf16.mxu1 %v3491_v3 }
 0x177   : > { %2168 = vmatpush1.bf16.msra.mxu0 %v3486_v4 }
 0x178   : > { %2209 = vmatpush1.bf16.msra.mxu1 %v3489_v5  ;;  %2169 = vmatprep.subr.bf16.mxu0 %v3494_v6 }
 0x179   : > { %2210 = vmatprep.subr.bf16.mxu1 %v3497_v7 }
 0x17b   : > { %2170 = vmatpush1.bf16.msra.mxu0 %v3492_v8  ;;  %v3512_v8 = vld [vmem:[%s4284_s14 + $0x38] sm:$0xff]  }
 0x17c   : > { %2211 = vmatpush1.bf16.msra.mxu1 %v3495_v9  ;;  %2171 = vmatprep.subr.bf16.mxu0 %v3500_v10  ;;  %v3513_v9 = vld [vmem:[%s4284_s14 + $0xb8] sm:$0xff]  }
 0x17d   : > { %2212 = vmatprep.subr.bf16.mxu1 %v3503_v11  ;;  %v3514_v11 = vld [vmem:[%s4284_s14 + $0x70] sm:$0xff]  }
 0x17f   : > { %2172 = vmatpush1.bf16.msra.mxu0 %v3498_v12  ;;  %v3515_v12 = vld [vmem:[%s4284_s14 + $0xf0] sm:$0xff]  }
 0x180   : > { %2213 = vmatpush1.bf16.msra.mxu1 %v3501_v13  ;;  %2173 = vmatprep.subr.bf16.mxu0 %v3506_v14  ;;  %v3516_v13 = vld [vmem:[%s4284_s14 + $0x30] sm:$0xff]  }
 0x181   : > { %2214 = vmatprep.subr.bf16.mxu1 %v3509_v15  ;;  %v3517_v14 = vld [vmem:[%s4284_s14 + $0xb0] sm:$0xff]   ;;  %v3518_v15 = vld [vmem:[%s4284_s14 + $0x68] sm:$0xff]  }
 0x183   : > { %2174 = vmatpush1.bf16.msra.mxu0 %v3504_v16  ;;  %v3519_v16 = vld [vmem:[%s4284_s14 + $0xe8] sm:$0xff]  }
 0x184   : > { %2215 = vmatpush1.bf16.msra.mxu1 %v3507_v17  ;;  %3134 = vmatprep.subr.bf16.mxu0 %v3510_v19  ;;  %v3520_v17 = vld [vmem:[%s4284_s14 + $0x28] sm:$0xff]   ;;  %v3522_v19 = vld [vmem:[%s4284_s14 + $0x60] sm:$0xff]  }
 0x185   : > { %3156 = vmatprep.subr.bf16.mxu1 %v3511_v20  ;;  %v3523_v20 = vld [vmem:[%s4284_s14 + $0xe0] sm:$0xff]  }
 0x1c6   : > { %v2974_v21 = vpop.f32.mrf.mxu0 }
 0x1c7   : > { %v2996_v22 = vpop.f32.mrf.mxu1 }
 0x1c8   : > { %v2975_v23 = vpop.f32.mrf.mxu0 }
 0x1c9   : > { %v2997_v24 = vpop.f32.mrf.mxu1  ;;  %v2976_v25 = vadd.f32 %v2975_v23, %v2974_v21  ;;  %v3524_v21 = vld [vmem:[%s4284_s14 + $0x20] sm:$0xff]   ;;  %v3526_v23 = vld [vmem:[%s4284_s14 + $0x58] sm:$0xff]  }
 0x1ca   : > { %v2998_v26 = vadd.f32 %v2997_v24, %v2996_v22  ;;  %v2977_v27 = vpop.f32.mrf.mxu0  ;;  %v3525_v22 = vld [vmem:[%s4284_s14 + $0xa0] sm:$0xff]   ;;  %v3527_v24 = vld [vmem:[%s4284_s14 + $0xd8] sm:$0xff]  }
 0x1cb   : > { %v2999_v28 = vpop.f32.mrf.mxu1  ;;  %v3530_v27 = vld [vmem:[%s4284_s14 + $0x50] sm:$0xff]  }
 0x1cc   : > { %v1306_v29 = vadd.f32 %v2998_v26, %v2976_v25  ;;  %v2978_v30 = vpop.f32.mrf.mxu0  ;;  %v3528_v25 = vld [vmem:[%s4284_s14 + $0x18] sm:$0xff]   ;;  %v3531_v28 = vld [vmem:[%s4284_s14 + $0xd0] sm:$0xff]  }
 0x1cd   : > { %v3000_v31 = vpop.f32.mrf.mxu1  ;;  %v3529_v26 = vld [vmem:[%s4284_s14 + $0x98] sm:$0xff]   ;;  %v3533_v30 = vld [vmem:[%s4284_s14 + $0x90] sm:$0xff]  }
 0x1ce   : > { %v3534_v31 = vld [vmem:[%s4284_s14 + $0x48] sm:$0xff]  }
 0x1e6   : > { %v3018_v32 = vpop.f32.mrf.mxu0 }
 0x1e7   : > { %v3040_v33 = vpop.f32.mrf.mxu1 }
 0x1e8   : > { %v3019_v35 = vpop.f32.mrf.mxu0 }
 0x1e9   : > { %v3041_v36 = vpop.f32.mrf.mxu1  ;;  %v3020_v50 = vadd.f32 %v3019_v35, %v3018_v32  ;;  %v3535_v32 = vld [vmem:[%s4284_s14 + $0xc8] sm:$0xff]  }
 0x1ea   : > { %v3021_v37 = vpop.f32.mrf.mxu0  ;;  %v3042_v52 = vadd.f32 %v3041_v36, %v3040_v33  ;;  %v3536_v33 = vld [vmem:[%s4284_s14 + $0x8] sm:$0xff]   ;;  %v3538_v36 = vld [vmem:[%s4284_s14 + $0x40] sm:$0xff]  }
 0x1eb   : > { %v3043_v38 = vpop.f32.mrf.mxu1  ;;  %v1346_v51 = vadd.f32 %v3020_v50, %v1306_v29  ;;  %v3532_v29 = vld [vmem:[%s4284_s14 + $0x10] sm:$0xff]   ;;  %v3537_v35 = vld [vmem:[%s4284_s14 + $0x88] sm:$0xff]   ;;  %v3539_v37 = vld [vmem:[%s4284_s14 + $0xc0] sm:$0xff]  }
 0x1ec   : > { %v3022_v39 = vpop.f32.mrf.mxu0  ;;  %v3540_v38 = vld [vmem:[%s4284_s14] sm:$0xff]  }
 0x1ed   : > { %v3044_v40 = vpop.f32.mrf.mxu1  ;;  %v1386_v53 = vadd.f32 %v3042_v52, %v1346_v51  ;;  %v3541_v39 = vld [vmem:[%s4284_s14 + $0x80] sm:$0xff]  }
 0x1ee   : > { %v1981_v40 = vsub.s32 0, %v4292_v34 }
 0x206   : > { %v3062_v41 = vpop.f32.mrf.mxu0 }
 0x207   : > { %v3084_v43 = vpop.f32.mrf.mxu1 }
 0x208   : > { %v3063_v44 = vpop.f32.mrf.mxu0 }
 0x209   : > { %v3085_v45 = vpop.f32.mrf.mxu1  ;;  %v3064_v42 = vadd.f32 %v3063_v44, %v3062_v41  ;;  %v1989_v41 = vsub.s32 2, %v4292_v34  ;;  %v1985_v44 = vsub.s32 1, %v4292_v34 }
 0x20a   : > { %v3065_v46 = vpop.f32.mrf.mxu0  ;;  %v3086_v55 = vadd.f32 %v3085_v45, %v3084_v43  ;;  %v1977_v43 = vld [vmem:[%s4475_s4] sm:$0xf]  ;;  %v1993_v45 = vsub.s32 3, %v4292_v34 }
 0x20b   : > { %v3087_v47 = vpop.f32.mrf.mxu1  ;;  %v1810_v54 = vadd.f32 %v3064_v42, %v1386_v53  ;;  %v1982_v46 = vrot.slane %v1977_v43, %v1981_v40 }
 0x20c   : > { %v3066_v48 = vpop.f32.mrf.mxu0  ;;  %v1990_v47 = vrot.slane %v1977_v43, %v1989_v41 }
 0x20d   : > { %v3088_v49 = vpop.f32.mrf.mxu1  ;;  %v1850_v60 = vadd.f32 %v3086_v55, %v1810_v54  ;;  %v1986_v48 = vrot.slane %v1977_v43, %v1985_v44 }
 0x20e   : > { %v1994_v49 = vrot.slane %v1977_v43, %v1993_v45 }
 0x226   : > { %v3106_v56 = vpop.f32.mrf.mxu0 }
 0x227   : > { %v3128_v57 = vpop.f32.mrf.mxu1 }
 0x228   : > { %v3107_v58 = vpop.f32.mrf.mxu0 }
 0x229   : > { %v3129_v59 = vpop.f32.mrf.mxu1  ;;  %v3108_v61 = vadd.f32 %v3107_v58, %v3106_v56 }
 0x22a   : > { %v3109_v62 = vpop.f32.mrf.mxu0  ;;  %v3130_v1 = vadd.f32 %v3129_v59, %v3128_v57 }
 0x22b   : > { %v3131_v63 = vpop.f32.mrf.mxu1  ;;  %v1890_v0 = vadd.f32 %v3108_v61, %v1850_v60 }
 0x22c   : > { %v3110_v3 = vpop.f32.mrf.mxu0 }
 0x22d   : > { %v3132_v4 = vpop.f32.mrf.mxu1  ;;  %v1930_v5 = vadd.f32 %v3130_v1, %v1890_v0 }
 0x22f   : > { %v1942_v6 = vadd.f32 %v2884_v2, %v1930_v5 }
 0x231   : > { %v1943_v7 = vmax.f32 %v1942_v6, 0.0 }
 0x233   : > { %v1944_v10 = vpack.c.bf16 %v1943_v7, %v1943_v7 }
 0x235   : > { %2192 = vmatmul.mubr.bf16.vlgmr.msra.gmra.mxu0 %v1944_v10  ;;  %2233 = vmatmul.mubr.bf16.vlgmr.msra.gmra.mxu1 %v1944_v10  ;;  %v2245_v10 = vld [vmem:[#allocation2] sm:$0x3] }
 0x236   : > { %3135 = vmatpush3.bf16.msra.mxu0 %v3512_v8  ;;  %3157 = vmatpush3.bf16.msra.mxu1 %v3513_v9 }
 0x237   : > { %3136 = vmatprep.subr.bf16.mxu0 %v3514_v11  ;;  %3158 = vmatprep.subr.bf16.mxu1 %v3515_v12 }
 0x23a   : > { %3137 = vmatpush3.bf16.msra.mxu0 %v3516_v13  ;;  %3159 = vmatpush3.bf16.msra.mxu1 %v3517_v14 }
 0x23b   : > { %3138 = vmatprep.subr.bf16.mxu0 %v3518_v15  ;;  %3160 = vmatprep.subr.bf16.mxu1 %v3519_v16 }
 0x23e   : > { %3139 = vmatpush3.bf16.msra.mxu0 %v3520_v17  ;;  %3161 = vmatpush3.bf16.msra.mxu1 %v3521_v18 }
 0x23f   : > { %3140 = vmatprep.subr.bf16.mxu0 %v3522_v19  ;;  %3162 = vmatprep.subr.bf16.mxu1 %v3523_v20 }
 0x242   : > { %3141 = vmatpush3.bf16.msra.mxu0 %v3524_v21  ;;  %3163 = vmatpush3.bf16.msra.mxu1 %v3525_v22 }
 0x243   : > { %3142 = vmatprep.subr.bf16.mxu0 %v3526_v23  ;;  %3164 = vmatprep.subr.bf16.mxu1 %v3527_v24 }
 0x246   : > { %3143 = vmatpush3.bf16.msra.mxu0 %v3528_v25  ;;  %3165 = vmatpush3.bf16.msra.mxu1 %v3529_v26 }
 0x247   : > { %3144 = vmatprep.subr.bf16.mxu0 %v3530_v27  ;;  %3166 = vmatprep.subr.bf16.mxu1 %v3531_v28 }
 0x24a   : > { %3145 = vmatpush3.bf16.msra.mxu0 %v3532_v29  ;;  %3167 = vmatpush3.bf16.msra.mxu1 %v3533_v30 }
 0x24b   : > { %3146 = vmatprep.subr.bf16.mxu0 %v3534_v31  ;;  %3168 = vmatprep.subr.bf16.mxu1 %v3535_v32 }
 0x24e   : > { %3147 = vmatpush3.bf16.msra.mxu0 %v3536_v33  ;;  %3169 = vmatpush3.bf16.msra.mxu1 %v3537_v35 }
 0x24f   : > { %3148 = vmatprep.subr.bf16.mxu0 %v3538_v36  ;;  %3170 = vmatprep.subr.bf16.mxu1 %v3539_v37 }
 0x252   : > { %3149 = vmatpush3.bf16.msra.mxu0 %v3540_v38  ;;  %3171 = vmatpush3.bf16.msra.mxu1 %v3541_v39 }
 0x2f5   : > { %v2193_v50 = vpop.f32.mrf.mxu0  ;;  %v2234_v51 = vpop.f32.mrf.mxu1 }
 0x2f6   : > { %v2194_v52 = vadd.f32 %v2193_v50, %v1982_v46  ;;  %v2235_v42 = vadd.f32 %v2234_v51, %v1990_v47 }
 0x2f7   : > { %v2195_v53 = vpop.f32.mrf.mxu0  ;;  %v2236_v54 = vpop.f32.mrf.mxu1 }
 0x2f8   : > { %v2196_v55 = vadd.f32 %v2195_v53, %v1986_v48  ;;  %v2237_v56 = vadd.f32 %v2236_v54, %v1994_v49  ;;  %v2241_v57 = vmax.f32 %v2194_v52, 0.0  ;;  %v2243_v58 = vmax.f32 %v2235_v42, 0.0 }
 0x2f9   : > { %v2197_v59 = vpop.f32.mrf.mxu0  ;;  %v2238_v60 = vpop.f32.mrf.mxu1 }
 0x2fa   : > { %v2242_v61 = vmax.f32 %v2196_v55, 0.0  ;;  %v2244_v62 = vmax.f32 %v2237_v56, 0.0  ;;  %v2246_v2 = vpack.c.bf16 %v2241_v57, %v2241_v57  ;;  %v2248_v3 = vpack.c.bf16 %v2243_v58, %v2243_v58 }
 0x2fb   : > { %v2198_v63 = vpop.f32.mrf.mxu0  ;;  %v2239_v34 = vpop.f32.mrf.mxu1 }
 0x2fc   : > { %v2247_v0 = vpack.c.bf16 %v2242_v61, %v2242_v61  ;;  %v2249_v1 = vpack.c.bf16 %v2244_v62, %v2244_v62 }
 0x2fe   : > { %2538 = vmatprep.mubr.bf16.mxu0 %v2247_v0  ;;  %2578 = vmatprep.mubr.bf16.mxu1 %v2249_v1 }
 0x2ff   : > { %2539 = vmatmul.mubr.bf16.vlgmr.msra.gmra.mxu0 %v2246_v2  ;;  %2579 = vmatmul.mubr.bf16.vlgmr.msra.gmra.mxu1 %v2248_v3 }
 0x3bf   : > { %v3150_v4 = vpop.f32.mrf.mxu0  ;;  %v3172_v5 = vpop.f32.mrf.mxu1 }
 0x3c1   : > { %v3151_v6 = vpop.f32.mrf.mxu0  ;;  %v3173_v7 = vpop.f32.mrf.mxu1 }
 0x3c2   : > { %v3152_v8 = vadd.f32 %v3151_v6, %v3150_v4  ;;  %v3174_v9 = vadd.f32 %v3173_v7, %v3172_v5 }
 0x3c3   : > { %v3153_v11 = vpop.f32.mrf.mxu0  ;;  %v3175_v12 = vpop.f32.mrf.mxu1 }
 0x3c4   : > { %v2581_v13 = vadd.f32 %v3174_v9, %v3152_v8  ;;  %2591 = sbr.rel (%p2949_p3) target bundleno = 979 (0x3d3), region = 88 }
 0x3c5   : > { %v3154_v14 = vpop.f32.mrf.mxu0  ;;  %v3176_v15 = vpop.f32.mrf.mxu1 }
 0x3c6   : > { %v2586_v16 = vadd.f32 %v2581_v13, %v2245_v10 }
 0x3c8   : > { %2587 = vst [vmem:[#allocation2] sm:$0x3] %v2586_v16 }
 0x3c9   : > { %v2950_v18 = vld [vmem:[%s4476_s20] ss:$0 sm:$0xff] }
 0x3cf   : > { %v2592_v17 = vld [vmem:[#allocation2] sm:$0x3] }
 0x3d0   : > { %v2600_v19 = vadd.f32 %v2950_v18, %v2592_v17 }
 0x3d2   : > { %2601 = vst [vmem:[#allocation17] sm:$0x3] %v2600_v19 }
 0x3d3 PF: > { %p3235_p10 = scmp.eq.s32.totalorder %s3987_s16, 2  ;;  %s3869_s6 = smov [#allocation17]  }
 0x3d4   : > { %s2609_s0 = sshll.u32 %s3869_s6, 4  ;;  %s2610_s0 = int_to_ptr.vmem [resolvable:$true] %s2609_s0 }
 0x3d5   : > { %s3724_s23 = scalar_lea.vmem %s2610_s0, 32  ;;  %p3731_p2 = scmp.lt.s32.totalorder %s2610_s0, %s2610_s0 }
 0x3d6   : > { %p3725_p11 = scmp.ne.s32.totalorder %s2610_s0, %s3724_s23  ;;  %p3732_p6 = scmp.lt.s32.totalorder %s3724_s23, %s3724_s23 }
 0x3d8   : > { %p3726_p9 = pnand %p3725_p11, %p3235_p10  ;;  %p3733_p8 = por %p3732_p6, %p3731_p2 }
 0x3da   : > { %p3727_p4 = pneg %p3726_p9 }
 0x3dc   : > { %p3734_p5 = pnand %p3733_p8, %p3727_p4 }
 0x3de   : > { %3737 = shalt.err (!%p3734_p5)
}
 0x3df   : > { %s4477_s24 = sld [smem:[#allocation38_spill]] }
 0x3e5   : > { %3201 = dma.vmem_to_hbm [thread:$0]  (%p3235_p10), %s2610_s0, 32, %s4477_s24, [#allocation8]  }
 0x3e6   : > { %3811 = dma.done.wait (%p3235_p10), [#allocation8], 32  }
 0x3e7   : > { %3813 = vsyncadd (%p3235_p10), [#allocation8], 4294967264 }
 0x3e8 PF: > { %s4478_s13 = sld [smem:[#allocation29_spill]]  ;;  %s4479_s22 = smov %s4147_s26 }
 0x3e9   : > { %s4480_s14 = sld [smem:[#allocation30_spill]]  ;;  %p37_p0 = scmp.ge.s32.totalorder %s4052_s15, 5  }
 0x3ea   : > { %s4481_s12 = sld [smem:[#allocation31_spill]]  ;;  %s4482_s0 = smov %s3820_s1 }
 0x3eb   : > { %s4483_s1 = smov %s3824_s25  ;;  %s4484_s25 = smov %s4201_s19 }
 0x3ec   : > { %s4486_s27 = smov %s3836_s28  ;;  %s4487_s28 = smov %s4479_s22 }
 0x3ed   : > { %s4488_s29 = smov %s3844_s30  ;;  %39 = sbr.rel (!%p37_p0) target bundleno = 29 (0x1d), region = 139 }
 0x3ee   : > { %s4485_s26 = smov %s4478_s13  ;;  %s4490_s13 = smov %s4052_s15 }
 0x3ef   : > { %s4489_s30 = smov %s4480_s14 }
 0x3f2   :  { %2622 = vsyncpa [#allocation7], 1 }
 0x3f3   :  { %2624 = vsyncpa [#allocation7 + $0x1], 1 }
 0x3f4   :  { %2625 = vsyncpa [#allocation10], 1 }
 0x3f5   :  { %2627 = vsyncpa [#allocation10 + $0x1], 1 }
 0x3f6   :  { %2628 = vsyncpa [#allocation13], 1 }
 0x3f7   :  { %2629 = vsyncpa [#allocation16], 1 }
 0x3f8   :  { %2631 = vsyncpa [#allocation16 + $0x1], 1 }
 0x3f9   :  { %2632 = vsyncpa [#allocation8], 1 }
 0x3fa   :  { %2634 = vsyncpa [#allocation8 + $0x1], 1 }

</bundles_post_ra>
